<compile_context>
chip_gen: v7x
topology: tpu7x:2x2x1
jax: 0.10.0
libtpu: 0.0.40
codegen_flags: <defaults>
</compile_context>

<pallas_src>
import functools

import jax
import jax.numpy as jnp
from jax.experimental import pallas as pl
from jax.experimental.pallas import tpu as pltpu


# Rows of flattened images per grid step: amortizes per-step pipeline overhead
# while keeping the resident input slab + bf16 output block a few MiB (safe on
# v7x's 64 MiB VMEM).
_TARGET_GROUP_ROWS = 2048
# Row sub-tile inside the kernel: (128, 256) f32 accumulator = 32 vregs.
_TM_MAX = 128


def _use_paired_taps() -> bool:
    """K=256 tap pairing fills the 256-deep MXU on v6e / v7x.  v5e and older
    chips have 128-deep MXUs where K=128 already matches, so skip pairing."""
    try:
        kind = jax.devices()[0].device_kind.lower()
    except Exception:
        return True
    return not any(v in kind for v in ("v2", "v3", "v4", "v5"))


def _deconv_kernel(x_ref, w_ref, o_ref, *, tm, halo, wp, pair_taps):
    """x_ref: (Rg, Cpad)      bf16  zero-padded flat rows of a group of images
       w_ref: (ntaps, K, NC)  bf16  effective sub-pixel weights (K = Cpad or 2*Cpad)
       o_ref: (Mg_pad, NC)    bf16  packed (py, px, Cout) outputs"""
    nc = o_ref.shape[-1]
    # Flat-row offset of each of the 9 (oy, ox) input taps (padded width wp).
    offs = [oy * wp + ox for oy in (-1, 0, 1) for ox in (-1, 0, 1)]
    n_tiles = o_ref.shape[0] // tm
    for t in range(n_tiles):                        # static loop: static slices
        base = t * tm + halo
        acc = jnp.zeros((tm, nc), jnp.float32)
        if pair_taps:                               # K = 2*Cpad = 256 per dot
            for p in range(5):
                a = x_ref[base + offs[2 * p]:base + offs[2 * p] + tm, :]
                if 2 * p + 1 < 9:
                    b = x_ref[base + offs[2 * p + 1]:base + offs[2 * p + 1] + tm, :]
                else:
                    b = a                           # weights for this half are zero
                acc = acc + jnp.dot(jnp.concatenate([a, b], axis=-1), w_ref[p],
                                    preferred_element_type=jnp.float32)
        else:                                       # K = Cpad = 128 per dot
            for k in range(9):
                a = x_ref[base + offs[k]:base + offs[k] + tm, :]
                acc = acc + jnp.dot(a, w_ref[k],
                                    preferred_element_type=jnp.float32)
        o_ref[t * tm:(t + 1) * tm, :] = acc.astype(o_ref.dtype)


def _build_w_eff(weight, cpad, pair_taps):
    """(Cin, Cout, 4, 4) PyTorch ConvTranspose2d weight -> effective sub-pixel
    weights: (9, cpad, 4*Cout), or tap-paired (5, 2*cpad, 4*Cout)."""
    cin, cout, kh, kw = weight.shape
    wf = weight.astype(jnp.float32)
    w = jnp.zeros((3, 3, cpad, 2, 2, cout), jnp.float32)
    for oy_i, oy in enumerate((-1, 0, 1)):
        for ox_i, ox in enumerate((-1, 0, 1)):
            for py in range(2):
                ky = py + 1 - 2 * oy
                if not 0 <= ky < kh:
                    continue
                for px in range(2):
                    kx = px + 1 - 2 * ox
                    if not 0 <= kx < kw:
                        continue
                    w = w.at[oy_i, ox_i, :cin, py, px, :].set(wf[:, :, ky, kx])
    w = w.reshape(9, cpad, 4 * cout)
    if pair_taps:
        w = jnp.concatenate([w, jnp.zeros((1, cpad, 4 * cout), w.dtype)], axis=0)
        w = w.reshape(5, 2 * cpad, 4 * cout)
    return w.astype(jnp.bfloat16)


def generator_forward(z, weight, *, out_dtype=jnp.bfloat16):
    """z: (N, 100, H, W) NCHW, weight: (100, 64, 4, 4) (PyTorch layout).
    Returns (N, 64, 2H, 2W) == ConvTranspose2d(100, 64, 4, 2, 1, bias=False)(z).
    NCHW in/out to match the torch module; NHWC-native callers could drop the
    two wrapper transposes (the only non-kernel HBM round trips)."""
    N, Cin, H, W = z.shape
    Cin_w, Cout, kH, kW = weight.shape
    assert Cin == Cin_w and (kH, kW) == (4, 4)

    Cpad = ((Cin + 127) // 128) * 128     # 100 -> 128: lane-aligned contraction
    Wp = W + 1                            # one zero column absorbs the +-1 col wrap
    Mp = H * Wp                           # flat rows per image core
    P = Wp + 1                            # max |flat shift|; per-image halo / gap
    NC = 4 * Cout                         # packed (py, px, Cout) lanes
    rows_per_img = Mp + P

    # Images per group / grid step: fatten the matmuls, but keep >= 2 grid steps
    # when N >= 2 so both TensorCores of a dual-TC chip get work.
    B = max(1, min(N, _TARGET_GROUP_ROWS // rows_per_img))
    if N >= 2 and pl.cdiv(N, B) < 2:
        B = pl.cdiv(N, 2)
    G = pl.cdiv(N, B)

    Mg = B * rows_per_img                               # output rows per group
    TM = _TM_MAX if Mg > _TM_MAX else ((Mg + 15) // 16) * 16
    Mg_pad = pl.cdiv(Mg, TM) * TM                       # sub-tile aligned rows
    Rg = ((Mg_pad + 2 * P + 15) // 16) * 16             # input rows (with halo)

    pair_taps = _use_paired_taps()
    ntaps = 5 if pair_taps else 9

    # NCHW -> NHWC bf16; pad W->Wp (zero col), Cin->Cpad (zero lanes), batch ->
    # G*B (zero images); flatten rows, add the per-image zero gap P and the
    # leading halo P.  All inter-image separation is zero rows, so each group is
    # one contiguous matmul; garbage rows are dropped in the epilogue.
    x = jnp.transpose(z, (0, 2, 3, 1)).astype(jnp.bfloat16)
    x = jnp.pad(x, ((0, G * B - N), (0, 0), (0, Wp - W), (0, Cpad - Cin)))
    x = x.reshape(G * B, Mp, Cpad)
    x = jnp.pad(x, ((0, 0), (0, P), (0, 0)))
    x = x.reshape(G, Mg, Cpad)
    x = jnp.pad(x, ((0, 0), (P, Rg - Mg - P), (0, 0)))          # (G, Rg, Cpad)

    w_eff = _build_w_eff(weight, Cpad, pair_taps)               # (ntaps, K, NC)

    kernel = functools.partial(_deconv_kernel, tm=TM, halo=P, wp=Wp,
                               pair_taps=pair_taps)
    out = pl.pallas_call(
        kernel,
        out_shape=jax.ShapeDtypeStruct((G, Mg_pad, NC), jnp.bfloat16),
        grid=(G,),
        in_specs=[
            pl.BlockSpec((None, Rg, Cpad), lambda g: (g, 0, 0)),
            # Constant-index weight block stays VMEM resident across the grid.
            # TODO(synk): pipeline_mode=pl.Buffered(1) would drop its redundant
            # second buffer; omitted to stay on the battle-tested code path.
            pl.BlockSpec((ntaps, w_eff.shape[1], NC), lambda g: (0, 0, 0)),
        ],
        out_specs=pl.BlockSpec((None, Mg_pad, NC), lambda g: (g, 0, 0)),
        compiler_params=pltpu.CompilerParams(
            dimension_semantics=("parallel",),
            vmem_limit_bytes=64 * 1024 * 1024),
        cost_estimate=pl.CostEstimate(
            flops=2 * G * Mg_pad * 9 * Cpad * NC,
            transcendentals=0,
            bytes_accessed=x.size * 2 + w_eff.size * 2 + G * Mg_pad * NC * 2),
    )(x, w_eff)

    # Drop alignment / gap rows and the pad column; one fused pixel-shuffle +
    # NHWC->NCHW transpose gives the final (N, Cout, 2H, 2W).
    out = out[:, :Mg, :].reshape(G * B, rows_per_img, NC)[:N, :Mp, :]
    out = out.reshape(N, H, Wp, 2, 2, Cout)[:, :, :W]
    y = jnp.transpose(out, (0, 5, 1, 3, 2, 4)).reshape(N, Cout, 2 * H, 2 * W)
    return y.astype(out_dtype)


def _reference_conv_transpose(z, weight, *, stride=2, pad=1):
    # Same bf16 input rounding as the kernel path; transposed conv expressed as
    # lhs-dilated conv with the flipped, transposed kernel.
    zb = z.astype(jnp.bfloat16).astype(jnp.float32)
    wb = weight.astype(jnp.bfloat16).astype(jnp.float32)
    kH, kW = weight.shape[2], weight.shape[3]
    w_conv = jnp.transpose(wb, (1, 0, 2, 3))[:, :, ::-1, ::-1]
    return jax.lax.conv_general_dilated(
        zb, w_conv,
        window_strides=(1, 1),
        padding=((kH - 1 - pad, kH - 1 - pad), (kW - 1 - pad, kW - 1 - pad)),
        lhs_dilation=(stride, stride),
        dimension_numbers=("NCHW", "OIHW", "NCHW"),
        precision=jax.lax.Precision.HIGHEST,
        preferred_element_type=jnp.float32,
    )


if __name__ == "__main__":
    key = jax.random.PRNGKey(0)
    k_z, k_w = jax.random.split(key)

    # Module-consistent small shapes: ConvTranspose2d requires Cin=100, Cout=64.
    N, Cin, H, W = 2, 100, 8, 8
    Cout, kH, kW = 64, 4, 4

    z = jax.random.normal(k_z, (N, Cin, H, W), dtype=jnp.float32)
    weight = 0.02 * jax.random.normal(k_w, (Cin, Cout, kH, kW), dtype=jnp.float32)

    y = jax.block_until_ready(generator_forward(z, weight))
    y_ref = jax.block_until_ready(_reference_conv_transpose(z, weight))

    assert y.shape == (N, Cout, 2 * H, 2 * W), y.shape
    y32 = y.astype(jnp.float32)
    max_err = float(jnp.max(jnp.abs(y32 - y_ref)))
    assert jnp.allclose(y32, y_ref, atol=2e-2, rtol=2e-2), max_err  # bf16 output

    print("KERNEL_OK")
</pallas_src>

<mosaic_0001>
module attributes {stable_mosaic.version = 11 : i64} {
  func.func @_deconv_kernel(%arg0: i32, %arg1: memref<1x128x128xbf16, #tpu.memory_space<vmem>>, %arg2: memref<5x256x256xbf16, #tpu.memory_space<vmem>>, %arg3: memref<1x96x256xbf16, #tpu.memory_space<vmem>>) attributes {dimension_semantics = [#tpu.dimension_semantics<parallel>], iteration_bounds = array<i64: 2>, scalar_prefetch = 0 : i64, scratch_operands = 0 : i64, tpu.core_type = #tpu.core_type<tc>, window_params = [{transform_indices = @transform_0, window_bounds = array<i64: 1, 128, 128>}, {pipeline_mode = #tpu.pipeline_mode<synchronous>, transform_indices = @transform_1, window_bounds = array<i64: 5, 256, 256>}, {transform_indices = @transform_2, window_bounds = array<i64: 1, 96, 256>}]} {
    %cst = arith.constant 0.000000e+00 : f32
    %0 = vector.broadcast %cst : f32 to vector<96x256xf32>
    %c0 = arith.constant 0 : index
    %c0_0 = arith.constant 0 : index
    %c0_1 = arith.constant 0 : index
    %1 = vector.load %arg1[%c0, %c0_0, %c0_1] : memref<1x128x128xbf16, #tpu.memory_space<vmem>>, vector<1x96x128xbf16>
    %2 = vector.shape_cast %1 : vector<1x96x128xbf16> to vector<96x128xbf16>
    %c0_2 = arith.constant 0 : index
    %c1 = arith.constant 1 : index
    %c0_3 = arith.constant 0 : index
    %3 = vector.load %arg1[%c0_2, %c1, %c0_3] : memref<1x128x128xbf16, #tpu.memory_space<vmem>>, vector<1x96x128xbf16>
    %4 = vector.shape_cast %3 : vector<1x96x128xbf16> to vector<96x128xbf16>
    %5 = tpu.concatenate %2, %4 in 1 : vector<96x128xbf16>, vector<96x128xbf16> -> vector<96x256xbf16>
    %c0_4 = arith.constant 0 : index
    %c0_5 = arith.constant 0 : index
    %c0_6 = arith.constant 0 : index
    %6 = vector.load %arg2[%c0_4, %c0_5, %c0_6] : memref<5x256x256xbf16, #tpu.memory_space<vmem>>, vector<1x256x256xbf16>
    %7 = vector.shape_cast %6 : vector<1x256x256xbf16> to vector<256x256xbf16>
    %cst_7 = arith.constant dense<0.000000e+00> : vector<96x256xf32>
    %8 = tpu.matmul %5, %7, %cst_7 {dimension_numbers = #tpu.dot_dimension_numbers<[1], [0], [0], [1], [0, 0, 1, 1], [], []>} : vector<96x256xbf16>, vector<256x256xbf16>, vector<96x256xf32> -> vector<96x256xf32>
    %9 = arith.addf %0, %8 : vector<96x256xf32>
    %c0_8 = arith.constant 0 : index
    %c2 = arith.constant 2 : index
    %c0_9 = arith.constant 0 : index
    %10 = vector.load %arg1[%c0_8, %c2, %c0_9] : memref<1x128x128xbf16, #tpu.memory_space<vmem>>, vector<1x96x128xbf16>
    %11 = vector.shape_cast %10 : vector<1x96x128xbf16> to vector<96x128xbf16>
    %c0_10 = arith.constant 0 : index
    %c9 = arith.constant 9 : index
    %c0_11 = arith.constant 0 : index
    %12 = vector.load %arg1[%c0_10, %c9, %c0_11] : memref<1x128x128xbf16, #tpu.memory_space<vmem>>, vector<1x96x128xbf16>
    %13 = vector.shape_cast %12 : vector<1x96x128xbf16> to vector<96x128xbf16>
    %14 = tpu.concatenate %11, %13 in 1 : vector<96x128xbf16>, vector<96x128xbf16> -> vector<96x256xbf16>
    %c1_12 = arith.constant 1 : index
    %c0_13 = arith.constant 0 : index
    %c0_14 = arith.constant 0 : index
    %15 = vector.load %arg2[%c1_12, %c0_13, %c0_14] : memref<5x256x256xbf16, #tpu.memory_space<vmem>>, vector<1x256x256xbf16>
    %16 = vector.shape_cast %15 : vector<1x256x256xbf16> to vector<256x256xbf16>
    %cst_15 = arith.constant dense<0.000000e+00> : vector<96x256xf32>
    %17 = tpu.matmul %14, %16, %cst_15 {dimension_numbers = #tpu.dot_dimension_numbers<[1], [0], [0], [1], [0, 0, 1, 1], [], []>} : vector<96x256xbf16>, vector<256x256xbf16>, vector<96x256xf32> -> vector<96x256xf32>
    %18 = arith.addf %9, %17 : vector<96x256xf32>
    %c0_16 = arith.constant 0 : index
    %c10 = arith.constant 10 : index
    %c0_17 = arith.constant 0 : index
    %19 = vector.load %arg1[%c0_16, %c10, %c0_17] : memref<1x128x128xbf16, #tpu.memory_space<vmem>>, vector<1x96x128xbf16>
    %20 = vector.shape_cast %19 : vector<1x96x128xbf16> to vector<96x128xbf16>
    %c0_18 = arith.constant 0 : index
    %c11 = arith.constant 11 : index
    %c0_19 = arith.constant 0 : index
    %21 = vector.load %arg1[%c0_18, %c11, %c0_19] : memref<1x128x128xbf16, #tpu.memory_space<vmem>>, vector<1x96x128xbf16>
    %22 = vector.shape_cast %21 : vector<1x96x128xbf16> to vector<96x128xbf16>
    %23 = tpu.concatenate %20, %22 in 1 : vector<96x128xbf16>, vector<96x128xbf16> -> vector<96x256xbf16>
    %c2_20 = arith.constant 2 : index
    %c0_21 = arith.constant 0 : index
    %c0_22 = arith.constant 0 : index
    %24 = vector.load %arg2[%c2_20, %c0_21, %c0_22] : memref<5x256x256xbf16, #tpu.memory_space<vmem>>, vector<1x256x256xbf16>
    %25 = vector.shape_cast %24 : vector<1x256x256xbf16> to vector<256x256xbf16>
    %cst_23 = arith.constant dense<0.000000e+00> : vector<96x256xf32>
    %26 = tpu.matmul %23, %25, %cst_23 {dimension_numbers = #tpu.dot_dimension_numbers<[1], [0], [0], [1], [0, 0, 1, 1], [], []>} : vector<96x256xbf16>, vector<256x256xbf16>, vector<96x256xf32> -> vector<96x256xf32>
    %27 = arith.addf %18, %26 : vector<96x256xf32>
    %c0_24 = arith.constant 0 : index
    %c18 = arith.constant 18 : index
    %c0_25 = arith.constant 0 : index
    %28 = vector.load %arg1[%c0_24, %c18, %c0_25] : memref<1x128x128xbf16, #tpu.memory_space<vmem>>, vector<1x96x128xbf16>
    %29 = vector.shape_cast %28 : vector<1x96x128xbf16> to vector<96x128xbf16>
    %c0_26 = arith.constant 0 : index
    %c19 = arith.constant 19 : index
    %c0_27 = arith.constant 0 : index
    %30 = vector.load %arg1[%c0_26, %c19, %c0_27] : memref<1x128x128xbf16, #tpu.memory_space<vmem>>, vector<1x96x128xbf16>
    %31 = vector.shape_cast %30 : vector<1x96x128xbf16> to vector<96x128xbf16>
    %32 = tpu.concatenate %29, %31 in 1 : vector<96x128xbf16>, vector<96x128xbf16> -> vector<96x256xbf16>
    %c3 = arith.constant 3 : index
    %c0_28 = arith.constant 0 : index
    %c0_29 = arith.constant 0 : index
    %33 = vector.load %arg2[%c3, %c0_28, %c0_29] : memref<5x256x256xbf16, #tpu.memory_space<vmem>>, vector<1x256x256xbf16>
    %34 = vector.shape_cast %33 : vector<1x256x256xbf16> to vector<256x256xbf16>
    %cst_30 = arith.constant dense<0.000000e+00> : vector<96x256xf32>
    %35 = tpu.matmul %32, %34, %cst_30 {dimension_numbers = #tpu.dot_dimension_numbers<[1], [0], [0], [1], [0, 0, 1, 1], [], []>} : vector<96x256xbf16>, vector<256x256xbf16>, vector<96x256xf32> -> vector<96x256xf32>
    %36 = arith.addf %27, %35 : vector<96x256xf32>
    %c0_31 = arith.constant 0 : index
    %c20 = arith.constant 20 : index
    %c0_32 = arith.constant 0 : index
    %37 = vector.load %arg1[%c0_31, %c20, %c0_32] : memref<1x128x128xbf16, #tpu.memory_space<vmem>>, vector<1x96x128xbf16>
    %38 = vector.shape_cast %37 : vector<1x96x128xbf16> to vector<96x128xbf16>
    %39 = tpu.concatenate %38, %38 in 1 : vector<96x128xbf16>, vector<96x128xbf16> -> vector<96x256xbf16>
    %c4 = arith.constant 4 : index
    %c0_33 = arith.constant 0 : index
    %c0_34 = arith.constant 0 : index
    %40 = vector.load %arg2[%c4, %c0_33, %c0_34] : memref<5x256x256xbf16, #tpu.memory_space<vmem>>, vector<1x256x256xbf16>
    %41 = vector.shape_cast %40 : vector<1x256x256xbf16> to vector<256x256xbf16>
    %cst_35 = arith.constant dense<0.000000e+00> : vector<96x256xf32>
    %42 = tpu.matmul %39, %41, %cst_35 {dimension_numbers = #tpu.dot_dimension_numbers<[1], [0], [0], [1], [0, 0, 1, 1], [], []>} : vector<96x256xbf16>, vector<256x256xbf16>, vector<96x256xf32> -> vector<96x256xf32>
    %43 = arith.addf %36, %42 : vector<96x256xf32>
    %44 = arith.truncf %43 : vector<96x256xf32> to vector<96x256xbf16>
    %c0_36 = arith.constant 0 : index
    %c0_37 = arith.constant 0 : index
    %c0_38 = arith.constant 0 : index
    %45 = vector.load %arg3[%c0_36, %c0_37, %c0_38] : memref<1x96x256xbf16, #tpu.memory_space<vmem>>, vector<1x96x256xbf16>
    %46 = vector.shape_cast %45 : vector<1x96x256xbf16> to vector<96x256xbf16>
    %47 = vector.shape_cast %44 : vector<96x256xbf16> to vector<1x96x256xbf16>
    tpu.vector_store %arg3[%c0_36, %c0_37, %c0_38], %47 {strides = array<i32>} : memref<1x96x256xbf16, #tpu.memory_space<vmem>>, vector<1x96x256xbf16>,
    return
  }
  func.func @transform_0(%arg0: i32) -> (i32, i32, i32) {
    %c0_i32 = arith.constant 0 : i32
    %c0_i32_0 = arith.constant 0 : i32
    %c0_i32_1 = arith.constant 0 : i32
    return %arg0, %c0_i32, %c0_i32_0 : i32, i32, i32
  }
  func.func @transform_1(%arg0: i32) -> (i32, i32, i32) {
    %c0_i32 = arith.constant 0 : i32
    %c0_i32_0 = arith.constant 0 : i32
    %c0_i32_1 = arith.constant 0 : i32
    %c0_i32_2 = arith.constant 0 : i32
    return %c0_i32, %c0_i32_0, %c0_i32_1 : i32, i32, i32
  }
  func.func @transform_2(%arg0: i32) -> (i32, i32, i32) {
    %c0_i32 = arith.constant 0 : i32
    %c0_i32_0 = arith.constant 0 : i32
    %c0_i32_1 = arith.constant 0 : i32
    return %arg0, %c0_i32, %c0_i32_0 : i32, i32, i32
  }
}

</mosaic_0001>

<bundles_post_ra>
// kernel: tpu_custom_call.1
= control target key start
LH: loop header
LB: loop body
LE: loop exit
PB: predicated region body
PF: predicated region fallthrough
CT: control target
= control target key end

     0   :  { %7 = vsyncpa [#allocation3], 0  ;;  %s3725_s0 = inlined_call_operand.hbm [shape: bf16[2,128,128], index: 0, kind: input, shape index: {}]   ;;  %s3726_s1 = inlined_call_operand.hbm [shape: bf16[5,256,256], index: 1, kind: input, shape index: {}]   ;;  %s3727_s2 = inlined_call_operand.hbm [shape: bf16[2,96,256], index: 2, kind: output, shape index: {}]  }
   0x1   :  { %9 = vsyncpa [#allocation3 + $0x1], 0 }
   0x2   :  { %10 = vsyncpa [#allocation6], 0 }
   0x3   :  { %11 = vsyncpa [#allocation4], 0 }
   0x4   :  { %13 = vsyncpa [#allocation4 + $0x1], 0  ;;  %s3158_s9 = smov 0   ;;  %s3160_s10 = smov 0  }
   0x5   :  { %s3162_s11 = smov 0   ;;  %s3164_s12 = smov 0  }
   0x6 LB: > { %s3179_s13 = sadd.s32 4294967295, %s3132_s12   ;;  %s2321_s14 = sadd.s32 4294967294, %s3132_s12   ;;  %s3132_s12 = sphi %s3164_s12, %s3747_s12   ;;  %s3128_s11 = sphi %s3162_s11, %s3746_s11   ;;  %s3124_s10 = sphi %s3160_s10, %s3745_s10   ;;  %s3120_s9 = sphi %s3158_s9, %s3744_s9  }
   0x7   : > { %p39_p0 = scmp.ne.s32.totalorder %s3124_s10, %s3120_s9  ;;  %p3728_p1 = scmp.eq.s32.totalorder %s3179_s13, 0 }
   0x8   : > { %p90_p3 = scmp.eq.s32.totalorder %s2321_s14, 1  ;;  %p2322_p5 = scmp.ge.s32.totalorder %s3132_s12, 1 }
   0x9   : > { %p3188_p4 = por %p3728_p1, %p39_p0  ;;  %p97_p7 = scmp.lt.s32.totalorder %s3132_s12, 3 }
   0xa   : > { %p3193_p6 = por %p90_p3, %p39_p0  ;;  %s3134_s18 = smov [#allocation5]  }
   0xb   : > { %s3731_s15 = scalar_select %p3188_p4, 1, 0 }
   0xc   : > { %s3732_s16 = scalar_select %p3193_p6, 1, 0 }
   0xd   : > { %p3198_p8 = pnand %p2322_p5, %p97_p7  ;;  %s109_s19 = sshll.u32 %s3134_s18, 4  ;;  %s3202_s19 = int_to_ptr.vmem [resolvable:$true] %s109_s19 }
   0xe   : > { %s3214_s21 = sadd.s32 1, %s3132_s12   ;;  %s26_s22 = sadd.s32 1, %s3128_s11 }
   0xf   : > { %s3733_s17 = scalar_select %p3198_p8, 1, 0 }
  0x10   : > { %p2683_p9 = pneg %p3198_p8  ;;  %s23_s23 = ssub.s32 %s3132_s12, %s3214_s21 }
  0x11   : > { %s3004_s26 = scalar_lea.hbm %s3726_s1, 20480 }
  0x12   : > { %p3209_p11 = pnand %p2683_p9, %p3728_p1  ;;  %p3005_p12 = scmp.ne.s32.totalorder %s3726_s1, %s3004_s26 }
  0x13   : > { %p3011_p5 = scmp.lt.u32.totalorder %s3004_s26, %s3726_s1 }
  0x14   : > { %p3006_p13 = pneg %p3209_p11 }
  0x16   : > { %p3007_p0 = pnand %p3006_p13, %p3005_p12 }
  0x18   : > { %p3008_p3 = pneg %p3007_p0 }
  0x1a   : > { %p3013_p7 = pnand %p3011_p5, %p3008_p3 }
  0x1c   : > { %3016 = shalt.err (!%p3013_p7)
}
  0x1d   : > { %s3017_s3 = scalar_lea.vmem %s3202_s19, 20480  ;;  %p3025_p2 = scmp.lt.s32.totalorder %s3202_s19, %s3202_s19 }
  0x1e   : > { %p3018_p9 = scmp.ne.s32.totalorder %s3202_s19, %s3017_s3  ;;  %p3026_p6 = scmp.lt.s32.totalorder %s3017_s3, %s3017_s3 }
  0x20   : > { %p3020_p10 = pnand %p3018_p9, %p3006_p13  ;;  %p3027_p4 = por %p3026_p6, %p3025_p2 }
  0x22   : > { %p3021_p1 = pneg %p3020_p10 }
  0x24   : > { %p3028_p8 = pnand %p3027_p4, %p3021_p1 }
  0x26   : > { %3031 = shalt.err (!%p3028_p8)
}
  0x27   : > { %s3135_s4 = smov 128   ;;  %s3136_s5 = smov 8  }
  0x28   : > { %2686 = dma.hbm_to_vmem [thread:$0]  (!%p3209_p11), %s3726_s1, 20480, %s3202_s19, [#allocation6], %s3135_s4, %s3135_s4, %s3136_s5  }
  0x29   : > { %p24_p2 = scmp.eq.s32.totalorder %s23_s23, 0  ;;  %p33_p1 = scmp.ne.s32.totalorder %s3128_s11, %s3124_s10 }
  0x2a   : > { %p34_p4 = scmp.eq.s32.totalorder %s3132_s12, 0  ;;  %p2696_p6 = scmp.lt.s32.totalorder %s3132_s12, 2 }
  0x2b   : > { %s3245_s8 = scalar_select %p24_p2, %s3128_s11, %s26_s22  }
  0x2c   : > { %p35_p8 = por %p34_p4, %p33_p1  ;;  %p3735_p10 = scmp.eq.s32.totalorder %s3179_s13, 1 }
  0x2d   : > { %s123_s18 = sand.u32 1, %s3128_s11   ;;  %s2532_s24 = sshll.u32 %s3132_s12, 10 }
  0x2e   : > { %p3249_p12 = por %p3735_p10, %p33_p1  ;;  %s2325_s25 = sshll.u32 %s123_s18, 6 }
  0x2f   : > { %s3258_s27 = scalar_lea.hbm %s3725_s0, %s2532_s24  ;;  %s127_s19 = scalar_lea.vmem [#allocation2], %s2325_s25 }
  0x30   : > { %s134_s22 = sshll.u32 %s127_s19, 4  ;;  %p3260_p11 = pnand %p2696_p6, %p35_p8  ;;  %s3264_s22 = int_to_ptr.vmem [resolvable:$true] %s134_s22 }
  0x31   : > { %s3266_s28 = scalar_lea.sflag [#allocation3], %s123_s18  ;;  %s3032_s29 = scalar_lea.hbm %s3258_s27, 1024 }
  0x32   : > { %p3033_p13 = scmp.ne.s32.totalorder %s3258_s27, %s3032_s29  ;;  %p3034_p0 = pneg %p3260_p11 }
  0x33   : > { %s3037_s4 = scalar_lea.hbm %s3725_s0, 2048  ;;  %p3038_p7 = scmp.lt.u32.totalorder %s3258_s27, %s3725_s0 }
  0x34   : > { %p3035_p3 = pnand %p3034_p0, %p3033_p13  ;;  %p3039_p9 = scmp.lt.u32.totalorder %s3037_s4, %s3032_s29 }
  0x35   : > { %p3041_p1 = scmp.lt.u32.totalorder %s3032_s29, %s3258_s27 }
  0x36   : > { %p3036_p5 = pneg %p3035_p3  ;;  %p3040_p2 = por %p3039_p9, %p3038_p7 }
  0x38   : > { %p3042_p4 = por %p3041_p1, %p3040_p2 }
  0x3a   : > { %p3043_p6 = pnand %p3042_p4, %p3036_p5 }
  0x3c   : > { %3046 = shalt.err (!%p3043_p6)
}
  0x3d   : > { %s3047_s7 = scalar_lea.vmem %s3264_s22, 1024  ;;  %s3137_s18 = smov [#allocation2]  }
  0x3e   : > { %p3048_p8 = scmp.ne.s32.totalorder %s3264_s22, %s3047_s7  ;;  %s3052_s24 = sshll.u32 %s3137_s18, 4  ;;  %s3053_s24 = int_to_ptr.vmem [resolvable:$false] %s3052_s24 }
  0x3f   : > { %s3054_s25 = scalar_lea.vmem %s3053_s24, 2048  ;;  %p3055_p3 = scmp.lt.s32.totalorder %s3264_s22, %s3053_s24 }
  0x40   : > { %p3050_p10 = pnand %p3048_p8, %p3034_p0  ;;  %p3056_p7 = scmp.lt.s32.totalorder %s3054_s25, %s3047_s7 }
  0x42   : > { %p3051_p13 = pneg %p3050_p10  ;;  %p3057_p9 = por %p3056_p7, %p3055_p3 }
  0x44   : > { %p3058_p2 = pnand %p3057_p9, %p3051_p13 }
  0x46   : > { %3061 = shalt.err (!%p3058_p2)
}
  0x47   : > { %s3138_s20 = smov 64   ;;  %s3139_s26 = smov 4  }
  0x48   : > { %2690 = dma.hbm_to_vmem [thread:$0]  (!%p3260_p11), %s3258_s27, 1024, %s3264_s22, %s3266_s28, %s3138_s20, %s3138_s20, %s3139_s26  }
  0x49   : > { %p3738_p0 = scmp.ne.s32.totalorder %s3733_s17, 0 }
  0x4a   : > { %s3297_s19 = sand.u32 (!%p3738_p0), 1, %s3124_s10   ;;  %p3739_p5 = scmp.ne.s32.totalorder (!%p3738_p0), %s3731_s15, 0 }
  0x4b   : > { %146 = sbr.rel (%p3738_p0) target bundleno = 530 (0x212), region = 28  ;;  %s2329_s29 = sshll.u32 (!%p3738_p0), %s3297_s19, 6 }
  0x4c   : > { %s149_s30 = scalar_lea.sflag (!%p3738_p0), [#allocation3], %s3297_s19  ;;  %s3301_s3 = scalar_lea.vmem (!%p3738_p0), [#allocation2], %s2329_s29 }
  0x52   : > { %3107 = dma.done.wait (%p3739_p5), %s149_s30, 1024  }
  0x53   : > { %3109 = vsyncadd (%p3739_p5), %s149_s30, 4294966272  ;;  %p3740_p11 = scmp.eq.s32.totalorder %s3179_s13, 0 }
  0x55   : > { %3111 = dma.done.wait (%p3740_p11), [#allocation6], 20480   ;;  %p3741_p1 = pmov %p3740_p11 }
  0x56   : > { %v2738_v0 = vld [vmem:[#allocation5 + $0x104] ss:$8 sps:$4 sm:$0xff]   ;;  %v2742_v2 = vld [vmem:[#allocation5 + $0x100] ss:$8 sps:$4 sm:$0xff]   ;;  %v2744_v4 = vld [vmem:[#allocation5 + $0x114] ss:$8 sps:$4 sm:$0xff]  }
  0x57   : > { %3113 = vsyncadd (%p3741_p1), [#allocation6], 4294946816  ;;  %v2740_v1 = vld [vmem:[#allocation5 + $0x204] ss:$8 sps:$4 sm:$0xff]   ;;  %621 = vmatprep.subr.bf16.mxu1 %v2738_v0  ;;  %v2743_v3 = vld [vmem:[#allocation5 + $0x200] ss:$8 sps:$4 sm:$0xff]  }
  0x58   : > { %1236 = vmatprep.subr.bf16.mxu0 %v2740_v1  ;;  %622 = vmatpush1.bf16.msra.mxu1 %v2742_v2  ;;  %v2746_v5 = vld [vmem:[#allocation5 + $0x214] ss:$8 sps:$4 sm:$0xff]   ;;  %v2748_v6 = vld [vmem:[#allocation5 + $0x110] ss:$8 sps:$4 sm:$0xff]   ;;  %v2750_v8 = vld [vmem:[#allocation5 + $0x124] ss:$8 sps:$4 sm:$0xff]  }
  0x59   : > { %1237 = vmatpush1.bf16.msra.mxu0 %v2743_v3  ;;  %623 = vmatprep.subr.bf16.mxu1 %v2744_v4  ;;  %v2749_v7 = vld [vmem:[#allocation5 + $0x210] ss:$8 sps:$4 sm:$0xff]   ;;  %v2752_v9 = vld [vmem:[#allocation5 + $0x224] ss:$8 sps:$4 sm:$0xff]   ;;  %v2754_v10 = vld [vmem:[#allocation5 + $0x120] ss:$8 sps:$4 sm:$0xff]  }
  0x5a   : > { %1238 = vmatprep.subr.bf16.mxu0 %v2746_v5  ;;  %v2755_v11 = vld [vmem:[#allocation5 + $0x220] ss:$8 sps:$4 sm:$0xff]   ;;  %v2756_v12 = vld [vmem:[#allocation5 + $0x134] ss:$8 sps:$4 sm:$0xff]   ;;  %v2760_v14 = vld [vmem:[#allocation5 + $0x130] ss:$8 sps:$4 sm:$0xff]  }
  0x5b   : > { %v2758_v13 = vld [vmem:[#allocation5 + $0x234] ss:$8 sps:$4 sm:$0xff]   ;;  %v2761_v15 = vld [vmem:[#allocation5 + $0x230] ss:$8 sps:$4 sm:$0xff]   ;;  %v2762_v16 = vld [vmem:[#allocation5 + $0x144] ss:$8 sps:$4 sm:$0xff]  }
  0x5c   : > { %624 = vmatpush1.bf16.msra.mxu1 %v2748_v6  ;;  %v2764_v17 = vld [vmem:[#allocation5 + $0x244] ss:$8 sps:$4 sm:$0xff]   ;;  %v2766_v18 = vld [vmem:[#allocation5 + $0x140] ss:$8 sps:$4 sm:$0xff]   ;;  %v2768_v20 = vld [vmem:[#allocation5 + $0x154] ss:$8 sps:$4 sm:$0xff]  }
  0x5d   : > { %1239 = vmatpush1.bf16.msra.mxu0 %v2749_v7  ;;  %625 = vmatprep.subr.bf16.mxu1 %v2750_v8  ;;  %v2767_v19 = vld [vmem:[#allocation5 + $0x240] ss:$8 sps:$4 sm:$0xff]   ;;  %v2770_v21 = vld [vmem:[#allocation5 + $0x254] ss:$8 sps:$4 sm:$0xff]   ;;  %v2772_v22 = vld [vmem:[#allocation5 + $0x150] ss:$8 sps:$4 sm:$0xff]  }
  0x5e   : > { %1240 = vmatprep.subr.bf16.mxu0 %v2752_v9  ;;  %v2773_v23 = vld [vmem:[#allocation5 + $0x250] ss:$8 sps:$4 sm:$0xff]   ;;  %v2774_v24 = vld [vmem:[#allocation5 + $0x164] ss:$8 sps:$4 sm:$0xff]   ;;  %v2778_v26 = vld [vmem:[#allocation5 + $0x160] ss:$8 sps:$4 sm:$0xff]  }
  0x5f   : > { %v2776_v25 = vld [vmem:[#allocation5 + $0x264] ss:$8 sps:$4 sm:$0xff]   ;;  %v2779_v27 = vld [vmem:[#allocation5 + $0x260] ss:$8 sps:$4 sm:$0xff]   ;;  %v2780_v28 = vld [vmem:[#allocation5 + $0x174] ss:$8 sps:$4 sm:$0xff]  }
  0x60   : > { %626 = vmatpush1.bf16.msra.mxu1 %v2754_v10  ;;  %v2782_v29 = vld [vmem:[#allocation5 + $0x274] ss:$8 sps:$4 sm:$0xff]   ;;  %v2784_v30 = vld [vmem:[#allocation5 + $0x170] ss:$8 sps:$4 sm:$0xff]   ;;  %v2786_v32 = vld [vmem:[#allocation5 + $0x184] ss:$8 sps:$4 sm:$0xff]  }
  0x61   : > { %1241 = vmatpush1.bf16.msra.mxu0 %v2755_v11  ;;  %627 = vmatprep.subr.bf16.mxu1 %v2756_v12  ;;  %v2785_v31 = vld [vmem:[#allocation5 + $0x270] ss:$8 sps:$4 sm:$0xff]   ;;  %v2788_v33 = vld [vmem:[#allocation5 + $0x284] ss:$8 sps:$4 sm:$0xff]   ;;  %v2790_v34 = vld [vmem:[#allocation5 + $0x180] ss:$8 sps:$4 sm:$0xff]  }
  0x62   : > { %1242 = vmatprep.subr.bf16.mxu0 %v2758_v13  ;;  %v2791_v35 = vld [vmem:[#allocation5 + $0x280] ss:$8 sps:$4 sm:$0xff]   ;;  %v2792_v36 = vld [vmem:[#allocation5 + $0x194] ss:$8 sps:$4 sm:$0xff]   ;;  %v2796_v38 = vld [vmem:[#allocation5 + $0x190] ss:$8 sps:$4 sm:$0xff]  }
  0x63   : > { %v2794_v37 = vld [vmem:[#allocation5 + $0x294] ss:$8 sps:$4 sm:$0xff]   ;;  %v2797_v39 = vld [vmem:[#allocation5 + $0x290] ss:$8 sps:$4 sm:$0xff]   ;;  %v2798_v40 = vld [vmem:[#allocation5 + $0x1a4] ss:$8 sps:$4 sm:$0xff]  }
  0x64   : > { %628 = vmatpush1.bf16.msra.mxu1 %v2760_v14  ;;  %v2800_v41 = vld [vmem:[#allocation5 + $0x2a4] ss:$8 sps:$4 sm:$0xff]   ;;  %v2802_v42 = vld [vmem:[#allocation5 + $0x1a0] ss:$8 sps:$4 sm:$0xff]   ;;  %v2804_v44 = vld [vmem:[#allocation5 + $0x1b4] ss:$8 sps:$4 sm:$0xff]  }
  0x65   : > { %1243 = vmatpush1.bf16.msra.mxu0 %v2761_v15  ;;  %629 = vmatprep.subr.bf16.mxu1 %v2762_v16  ;;  %v2803_v43 = vld [vmem:[#allocation5 + $0x2a0] ss:$8 sps:$4 sm:$0xff]   ;;  %v2806_v45 = vld [vmem:[#allocation5 + $0x2b4] ss:$8 sps:$4 sm:$0xff]   ;;  %v2808_v46 = vld [vmem:[#allocation5 + $0x1b0] ss:$8 sps:$4 sm:$0xff]  }
  0x66   : > { %1244 = vmatprep.subr.bf16.mxu0 %v2764_v17  ;;  %v2809_v47 = vld [vmem:[#allocation5 + $0x2b0] ss:$8 sps:$4 sm:$0xff]   ;;  %v3312_v48 = vld [vmem:[%s3301_s3 + $0x4] sm:$0xf]  ;;  %v179_v49 = vld [vmem:[%s3301_s3 + $0x8] sm:$0xf] }
  0x67   : > { %v180_v50 = vld [vmem:[%s3301_s3 + $0xc] sm:$0xf]  ;;  %v3317_v51 = vld [vmem:[%s3301_s3 + $0x10] sm:$0xf]  ;;  %v2339_v52 = vcombine.low %v3312_v48, %v179_v49  ;;  %vm337_vm0 = vsmask.f32 256 }
  0x68   : > { %630 = vmatpush1.bf16.msra.mxu1 %v2766_v18  ;;  %v3321_v53 = vcombine.low %v180_v50, %v3317_v51  ;;  %v967_v54 = vld [vmem:[%s3301_s3 + $0x4] sm:$0xe]  ;;  %v3327_v58 = vld [vmem:[%s3301_s3 + $0x14] sm:$0xf]  ;;  %v3332_v63 = vld [vmem:[%s3301_s3 + $0x18] sm:$0xf] }
  0x69   : > { %1245 = vmatpush1.bf16.msra.mxu0 %v2767_v19  ;;  %631 = vmatprep.subr.bf16.mxu1 %v2768_v20  ;;  %v2810_v55 = vld [vmem:[#allocation5 + $0x1c4] ss:$8 sps:$4 sm:$0xff]   ;;  %v3324_v57 = vcombine.low %v967_v54, %v179_v49  ;;  %v339_v59 = vshrl.u32 %v2339_v52, 16  ;;  %v342_v60 = vshll.u32 %v2339_v52, 16  ;;  %v2814_v0 = vld [vmem:[#allocation5 + $0x1c0] ss:$8 sps:$4 sm:$0xff]   ;;  %v3336_v1 = vcombine.low %v3327_v58, %v3332_v63 }
  0x6a   : > { %1246 = vmatprep.subr.bf16.mxu0 %v2770_v21  ;;  %v2812_v56 = vld [vmem:[#allocation5 + $0x2c4] ss:$8 sps:$4 sm:$0xff]   ;;  %v346_v61 = vshrl.u32 %v3321_v53, 16  ;;  %v349_v62 = vshll.u32 %v3321_v53, 16  ;;  %v2815_v4 = vld [vmem:[#allocation5 + $0x2c0] ss:$8 sps:$4 sm:$0xff]  }
  0x6b   : > { %v976_v2 = vshrl.u32 %v3324_v57, 16  ;;  %v978_v3 = vshll.u32 %v3324_v57, 16  ;;  %v341_v5 = vrot.slane %v339_v59, 7  ;;  %v2816_v8 = vld [vmem:[#allocation5 + $0x1d4] ss:$8 sps:$4 sm:$0xff]   ;;  %v357_v10 = vshll.u32 %v3336_v1, 16 }
  0x6c   : > { %632 = vmatpush1.bf16.msra.mxu1 %v2772_v22  ;;  %v348_v6 = vrot.slane %v346_v61, 7  ;;  %v982_v7 = vrot.slane %v349_v62, 1  ;;  %v2818_v9 = vld [vmem:[#allocation5 + $0x2d4] ss:$8 sps:$4 sm:$0xff]   ;;  %v2820_v12 = vld [vmem:[#allocation5 + $0x1d0] ss:$8 sps:$4 sm:$0xff]  }
  0x6d   : > { %1247 = vmatpush1.bf16.msra.mxu0 %v2773_v23  ;;  %633 = vmatprep.subr.bf16.mxu1 %v2774_v24  ;;  %v980_v11 = vrot.slane %v978_v3, 1  ;;  %v344_v13 = vor.u32 %v342_v60, %v341_v5  ;;  %vm229_vm1 = vsmask.f32 7424  ;;  %v2821_v16 = vld [vmem:[#allocation5 + $0x2d0] ss:$8 sps:$4 sm:$0xff]   ;;  %v3341_v18 = vrot.slane %v357_v10, 1 }
  0x6e   : > { %1248 = vmatprep.subr.bf16.mxu0 %v2776_v25  ;;  %v351_v14 = vor.u32 %v349_v62, %v348_v6  ;;  %v984_v15 = vor.u32 %v982_v7, %v346_v61  ;;  %v354_v19 = vshrl.u32 %v3336_v1, 16  ;;  %v2822_v20 = vld [vmem:[#allocation5 + $0x1e4] ss:$8 sps:$4 sm:$0xff]   ;;  %vm422_vm2 = vcmask 1046528   ;;  %v2842_v52 = vld [vmem:[#allocation5 + $0x300] ss:$8 sps:$4 sm:$0xff]  }
  0x6f   : > { %v981_v17 = vor.u32 %v980_v11, %v976_v2  ;;  %v2824_v21 = vld [vmem:[#allocation5 + $0x2e4] ss:$8 sps:$4 sm:$0xff]   ;;  %v426_v23 = vrot.slane %v344_v13, 1  ;;  %v3377_v59 = vld [vmem:[%s3301_s3 + $0x20] sm:$0xf]  ;;  %v3381_v60 = vcombine.low %v3317_v51, %v3327_v58  ;;  %v1044_v11 = vrot.slane %v3336_v1, 1 }
  0x70   : > { %634 = vmatpush1.bf16.msra.mxu1 %v2778_v26  ;;  %v352_v22 = vsel %vm337_vm0, %v341_v5, %v351_v14  ;;  %v3348_v26 = vsel %vm229_vm1, %v984_v15, %v3341_v18  ;;  %v2848_v61 = vld [vmem:[#allocation5 + $0x14] ss:$8 sps:$4 sm:$0xff]   ;;  %v2846_v2 = vld [vmem:[#allocation5 + $0x10] ss:$8 sps:$4 sm:$0xff]   ;;  %v987_v51 = vor.u32 %v3341_v18, %v354_v19  ;;  %v3398_v13 = vld [vmem:[%s3301_s3 + $0x28] sm:$0xf] }
  0x71   : > { %1249 = vmatpush1.bf16.msra.mxu0 %v2779_v27  ;;  %635 = vmatprep.subr.bf16.mxu1 %v2780_v28  ;;  %v427_v24 = vrot.slane %v352_v22, 1  ;;  %v983_v25 = vsel %vm229_vm1, %v981_v17, %v982_v7  ;;  %v320_v27 = vld [vmem:[%s3301_s3] sm:$0xe]  ;;  %v3353_v28 = vrot.slane %v354_v19, 7  ;;  %v2851_v62 = vld [vmem:[#allocation5 + $0x314] ss:$8 sps:$4 sm:$0xff]  }
  0x72   : > { %1250 = vmatprep.subr.bf16.mxu0 %v2782_v29  ;;  %v1041_v29 = vrot.slane %v983_v25, 1  ;;  %v2849_v5 = vld [vmem:[#allocation5 + $0x310] ss:$8 sps:$4 sm:$0xff]   ;;  %v2854_v7 = vld [vmem:[#allocation5 + $0x24] ss:$8 sps:$4 sm:$0xff]   ;;  %vm1843_vm3 = vcmask 1045504  }
  0x73   : > { %v2852_v14 = vld [vmem:[#allocation5 + $0x20] ss:$8 sps:$4 sm:$0xff]   ;;  %s2673_s15 = smul.u32 96, %s3297_s19  ;;  %s2225_s4 = scalar_lea.sflag [#allocation4], %s3297_s19 }
  0x74   : > { %636 = vmatpush1.bf16.msra.mxu1 %v2784_v30  ;;  %v1042_v30 = vrot.slane %v3348_v26, 1  ;;  %v2855_v15 = vld [vmem:[#allocation5 + $0x320] ss:$8 sps:$4 sm:$0xff]   ;;  %s2674_s27 = smul.u32 1536, %s3179_s13  ;;  %s3140_s6 = smov [#allocation7]  }
  0x75   : > { %1251 = vmatpush1.bf16.msra.mxu0 %v2785_v31  ;;  %637 = vmatprep.subr.bf16.mxu1 %v2786_v32  ;;  %v2826_v31 = vld [vmem:[#allocation5 + $0x1e0] ss:$8 sps:$4 sm:$0xff]   ;;  %v3356_v32 = vcombine.low %v179_v49, %v180_v50  ;;  %v2844_v49 = vld [vmem:[#allocation5 + $0x304] ss:$8 sps:$4 sm:$0xff]   ;;  %s3648_s17 = scalar_lea.vmem [#allocation7], %s2673_s15  ;;  %s3066_s7 = sshll.u32 %s3140_s6, 4  ;;  %s3067_s7 = int_to_ptr.vmem [resolvable:$false] %s3066_s7 }
  0x76   : > { %1252 = vmatprep.subr.bf16.mxu0 %v2788_v33  ;;  %v428_v33 = vsel %vm422_vm2, %v426_v23, %v427_v24  ;;  %v2838_v50 = vld [vmem:[#allocation5] ss:$8 sps:$4 sm:$0xff]   ;;  %v2863_v23 = vld [vmem:[#allocation5 + $0x334] ss:$8 sps:$4 sm:$0xff]   ;;  %s2238_s22 = sshll.u32 %s3648_s17, 4  ;;  %s3675_s28 = scalar_lea.hbm %s3727_s2, %s2674_s27  ;;  %s3677_s22 = int_to_ptr.vmem [resolvable:$true] %s2238_s22 }
  0x77   : > { %653 = vmatprep.mubr.bf16.mxu1 %v428_v33  ;;  %s3062_s5 = scalar_lea.vmem %s3677_s22, 1536  ;;  %s3068_s18 = scalar_lea.vmem %s3067_s7, 3072 }
  0x78   : > { %638 = vmatpush1.bf16.msra.mxu1 %v2790_v34  ;;  %v2827_v34 = vld [vmem:[#allocation5 + $0x2e0] ss:$8 sps:$4 sm:$0xff]   ;;  %p3063_p4 = scmp.ne.s32.totalorder %s3677_s22, %s3062_s5  ;;  %p3069_p10 = scmp.lt.s32.totalorder %s3677_s22, %s3067_s7 }
  0x79   : > { %1253 = vmatpush1.bf16.msra.mxu0 %v2791_v35  ;;  %639 = vmatprep.subr.bf16.mxu1 %v2792_v36  ;;  %v2828_v35 = vld [vmem:[#allocation5 + $0x1f4] ss:$8 sps:$4 sm:$0xff]   ;;  %v1043_v36 = vsel %vm422_vm2, %v1041_v29, %v1042_v30  ;;  %p3070_p13 = scmp.lt.s32.totalorder %s3068_s18, %s3062_s5 }
  0x7a   : > { %1254 = vmatprep.subr.bf16.mxu0 %v2794_v37  ;;  %v2338_v37 = vcombine.low %v320_v27, %v3312_v48  ;;  %1268 = vmatprep.mubr.bf16.mxu0 %v1043_v36  ;;  %p3064_p6 = pnand %p3063_p4, %p3249_p12 }
  0x7b   : > { %p3071_p3 = por %p3070_p13, %p3069_p10 }
  0x7c   : > { %640 = vmatpush1.bf16.msra.mxu1 %v2796_v38  ;;  %v359_v38 = vor.u32 %v357_v10, %v3353_v28  ;;  %p3065_p8 = pneg %p3064_p6 }
  0x7d   : > { %1255 = vmatpush1.bf16.msra.mxu0 %v2797_v39  ;;  %641 = vmatprep.subr.bf16.mxu1 %v2798_v40  ;;  %v2830_v39 = vld [vmem:[#allocation5 + $0x2f4] ss:$8 sps:$4 sm:$0xff]   ;;  %v2832_v40 = vld [vmem:[#allocation5 + $0x1f0] ss:$8 sps:$4 sm:$0xff]  }
  0x7e   : > { %1256 = vmatprep.subr.bf16.mxu0 %v2800_v41  ;;  %v2833_v41 = vld [vmem:[#allocation5 + $0x2f0] ss:$8 sps:$4 sm:$0xff]   ;;  %p3072_p7 = pnand %p3071_p3, %p3065_p8 }
  0x80   : > { %642 = vmatpush1.bf16.msra.mxu1 %v2802_v42  ;;  %v424_v42 = vrot.slane %v3356_v32, 1 }
  0x81   : > { %1257 = vmatpush1.bf16.msra.mxu0 %v2803_v43  ;;  %643 = vmatprep.subr.bf16.mxu1 %v2804_v44  ;;  %v2840_v43 = vld [vmem:[#allocation5 + $0x4] ss:$8 sps:$4 sm:$0xff]   ;;  %v423_v44 = vrot.slane %v2338_v37, 1 }
  0x82   : > { %1258 = vmatprep.subr.bf16.mxu0 %v2806_v45  ;;  %v1038_v45 = vrot.slane %v3324_v57, 1 }
  0x84   : > { %644 = vmatpush1.bf16.msra.mxu1 %v2808_v46  ;;  %v1039_v46 = vrot.slane %v3321_v53, 1 }
  0x85   : > { %1259 = vmatpush1.bf16.msra.mxu0 %v2809_v47  ;;  %645 = vmatprep.subr.bf16.mxu1 %v2810_v55  ;;  %v3368_v47 = vsel %vm337_vm0, %v348_v6, %v359_v38  ;;  %v184_v55 = vld [vmem:[%s3301_s3 + $0x1c] sm:$0xf]  ;;  %v429_v6 = vrot.slane %v3381_v60, 1  ;;  %v3425_v38 = vld [vmem:[%s3301_s3 + $0x2c] sm:$0xf] }
  0x86   : > { %1260 = vmatprep.subr.bf16.mxu0 %v2812_v56  ;;  %v431_v54 = vrot.slane %v3368_v47, 1  ;;  %v425_v56 = vsel %vm422_vm2, %v423_v44, %v424_v42  ;;  %v1040_v57 = vsel %vm422_vm2, %v1038_v45, %v1039_v46  ;;  %v3405_v19 = vcombine.low %v3332_v63, %v184_v55  ;;  %v2858_v63 = vld [vmem:[#allocation5 + $0x30] ss:$8 sps:$4 sm:$0xff]   ;;  %v2864_v44 = vld [vmem:[#allocation5 + $0x40] ss:$8 sps:$4 sm:$0xff]  }
  0x87   : > { %v430_v22 = vsel %vm422_vm2, %v424_v42, %v429_v6 }
  0x88   : > { %646 = vmatpush1.bf16.msra.mxu1 %v2814_v0  ;;  %v3384_v0 = vcombine.low %v184_v55, %v3377_v59  ;;  %v432_v3 = vsel %vm422_vm2, %v427_v24, %v431_v54  ;;  %v433_v37 = vrot.slane %v3405_v19, 1 }
  0x89   : > { %1261 = vmatpush1.bf16.msra.mxu0 %v2815_v4  ;;  %647 = vmatprep.subr.bf16.mxu1 %v2816_v8  ;;  %v2857_v8 = vld [vmem:[#allocation5 + $0x324] ss:$8 sps:$4 sm:$0xff]  }
  0x8a   : > { %1262 = vmatprep.subr.bf16.mxu0 %v2818_v9  ;;  %v365_v4 = vshll.u32 %v3384_v0, 16  ;;  %v362_v58 = vshrl.u32 %v3384_v0, 16  ;;  %v434_v45 = vsel %vm422_vm2, %v429_v6, %v433_v37 }
  0x8c   : > { %648 = vmatpush1.bf16.msra.mxu1 %v2820_v12  ;;  %v988_v9 = vrot.slane %v365_v4, 1  ;;  %v364_v10 = vrot.slane %v362_v58, 7  ;;  %v186_v12 = vld [vmem:[%s3301_s3 + $0x24] sm:$0xf] }
  0x8d   : > { %1263 = vmatpush1.bf16.msra.mxu0 %v2821_v16  ;;  %649 = vmatprep.subr.bf16.mxu1 %v2822_v20  ;;  %v3402_v18 = vcombine.low %v186_v12, %v3398_v13  ;;  %v2860_v20 = vld [vmem:[#allocation5 + $0x34] ss:$8 sps:$4 sm:$0xff]  }
  0x8e   : > { %1264 = vmatprep.subr.bf16.mxu0 %v2824_v21  ;;  %v989_v16 = vsel %vm229_vm1, %v987_v51, %v988_v9  ;;  %v367_v17 = vor.u32 %v365_v4, %v364_v10  ;;  %v990_v27 = vor.u32 %v988_v9, %v362_v58  ;;  %v2918_v58 = vld [vmem:[%s3301_s3 + $0x34] ss:$0 sps:$4 sm:$0x33]   ;;  %v2880_v9 = vld [vmem:[#allocation5 + $0x64] ss:$8 sps:$4 sm:$0xff]  }
  0x8f   : > { %v1046_v21 = vrot.slane %v989_v16, 1  ;;  %v373_v25 = vshll.u32 %v3402_v18, 16  ;;  %v370_v29 = vshrl.u32 %v3402_v18, 16  ;;  %v998_v1 = vshll.u32 %v2918_v58, 16 }
  0x90   : > { %650 = vmatpush1.bf16.msra.mxu1 %v2826_v31  ;;  %v368_v24 = vsel %vm337_vm0, %v3353_v28, %v367_v17  ;;  %v2861_v31 = vld [vmem:[#allocation5 + $0x330] ss:$8 sps:$4 sm:$0xff]   ;;  %v1045_v28 = vsel %vm422_vm2, %v1039_v46, %v1044_v11  ;;  %v1048_v46 = vrot.slane %v3384_v0, 1  ;;  %v1002_v17 = vshrl.u32 %v2918_v58, 16 }
  0x91   : > { %1265 = vmatpush1.bf16.msra.mxu0 %v2827_v34  ;;  %651 = vmatprep.subr.bf16.mxu1 %v2828_v35  ;;  %v1047_v33 = vsel %vm422_vm2, %v1042_v30, %v1046_v21  ;;  %v435_v34 = vrot.slane %v368_v24, 1  ;;  %v2866_v35 = vld [vmem:[#allocation5 + $0x44] ss:$8 sps:$4 sm:$0xff]   ;;  %v991_v36 = vrot.slane %v373_v25, 1  ;;  %v372_v30 = vrot.slane %v370_v29, 7 }
  0x92   : > { %1266 = vmatprep.subr.bf16.mxu0 %v2830_v39  ;;  %v321_v39 = vld [vmem:[%s3301_s3 + $0x30] sm:$0xf]  ;;  %v1049_v4 = vsel %vm422_vm2, %v1044_v11, %v1048_v46  ;;  %v2881_v11 = vld [vmem:[#allocation5 + $0x360] ss:$8 sps:$4 sm:$0xff]   ;;  %v2889_v24 = vld [vmem:[#allocation5 + $0x374] ss:$8 sps:$4 sm:$0xff]  }
  0x93   : > { %v436_v26 = vsel %vm422_vm2, %v431_v54, %v435_v34  ;;  %v992_v53 = vsel %vm229_vm1, %v990_v27, %v991_v36  ;;  %v3461_v27 = vcombine.low %v3398_v13, %v3425_v38  ;;  %v2887_v13 = vld [vmem:[#allocation5 + $0x370] ss:$8 sps:$4 sm:$0xff]  }
  0x94   : > { %652 = vmatpush1.bf16.msra.mxu1 %v2832_v40  ;;  %v2869_v40 = vld [vmem:[#allocation5 + $0x344] ss:$8 sps:$4 sm:$0xff]   ;;  %v1050_v42 = vrot.slane %v992_v53, 1  ;;  %v2895_v53 = vld [vmem:[#allocation5 + $0x380] ss:$8 sps:$4 sm:$0xff]  }
  0x95   : > { %1267 = vmatpush1.bf16.msra.mxu0 %v2833_v41  ;;  %874 = vmatprep.subr.bf16.mxu1 %v2840_v43  ;;  %v3430_v41 = vcombine.low %v3425_v38, %v321_v39  ;;  %v375_v43 = vor.u32 %v373_v25, %v372_v30 }
  0x96   : > { %1689 = vmatprep.subr.bf16.mxu0 %v2844_v49  ;;  %v993_v49 = vor.u32 %v991_v36, %v370_v29  ;;  %v1051_v54 = vsel %vm422_vm2, %v1046_v21, %v1050_v42 }
  0x97   : > { %654 = vmatmul.mubr.bf16.vlgmr.msra.gmra.mrb[0].mxu1 %v425_v56  ;;  %v381_v47 = vshll.u32 %v3430_v41, 16  ;;  %v376_v55 = vsel %vm337_vm0, %v364_v10, %v375_v43  ;;  %v3440_v56 = vcombine.low %v3377_v59, %v186_v12  ;;  %v2883_v10 = vld [vmem:[#allocation5 + $0x364] ss:$8 sps:$4 sm:$0xff]   ;;  %v1056_v38 = vrot.slane %v3430_v41, 1 }
  0x98   : > { %1269 = vmatmul.mubr.bf16.vlgmr.msra.gmra.mrb[0].mxu0 %v1040_v57  ;;  %875 = vmatpush1.bf16.msra.mxu1 %v2838_v50  ;;  %v2867_v50 = vld [vmem:[#allocation5 + $0x340] ss:$8 sps:$4 sm:$0xff]   ;;  %v378_v57 = vshrl.u32 %v3430_v41, 16  ;;  %v3475_v43 = vld [vmem:[%s3301_s3 + $0x30] ss:$0 sps:$4 sm:$0x11]  }
  0x99   : > { %1690 = vmatpush1.bf16.msra.mxu0 %v2842_v52  ;;  %876 = vmatprep.subr.bf16.mxu1 %v2848_v61  ;;  %v2872_v52 = vld [vmem:[#allocation5 + $0x54] ss:$8 sps:$4 sm:$0xff]   ;;  %v994_v0 = vrot.slane %v381_v47, 1  ;;  %v2923_v41 = vld [vmem:[#allocation5 + $0x3c0] ss:$8 sps:$4 sm:$0xff]  }
  0x9a   : > { %1691 = vmatprep.subr.bf16.mxu0 %v2851_v62  ;;  %663 = vmatprep.mubr.bf16.mxu1 %v432_v3  ;;  %v2875_v61 = vld [vmem:[#allocation5 + $0x354] ss:$8 sps:$4 sm:$0xff]   ;;  %v439_v62 = vrot.slane %v376_v55, 1  ;;  %v380_v3 = vrot.slane %v378_v57, 7  ;;  %v3487_v55 = vld [vmem:[%s3301_s3 + $0xc] sm:$0xf] }
  0x9b   : > { %1278 = vmatprep.mubr.bf16.mxu0 %v1047_v33  ;;  %v995_v59 = vsel %vm229_vm1, %v993_v49, %v994_v0  ;;  %v996_v12 = vor.u32 %v994_v0, %v378_v57  ;;  %v2884_v33 = vld [vmem:[#allocation5 + $0x70] ss:$8 sps:$4 sm:$0xff]   ;;  %v238_v49 = vshll.u32 %v3356_v32, 16 }
  0x9c   : > { %877 = vmatpush1.bf16.msra.mxu1 %v2846_v2  ;;  %v2870_v2 = vld [vmem:[#allocation5 + $0x50] ss:$8 sps:$4 sm:$0xff]   ;;  %v440_v51 = vsel %vm422_vm2, %v435_v34, %v439_v62  ;;  %v1054_v6 = vrot.slane %v995_v59, 1 }
  0x9d   : > { %1692 = vmatpush1.bf16.msra.mxu0 %v2849_v5  ;;  %878 = vmatprep.subr.bf16.mxu1 %v2854_v7  ;;  %v2873_v5 = vld [vmem:[#allocation5 + $0x350] ss:$8 sps:$4 sm:$0xff]   ;;  %v437_v7 = vrot.slane %v3440_v56, 1 }
  0x9e   : > { %1693 = vmatprep.subr.bf16.mxu0 %v2857_v8  ;;  %v383_v8 = vor.u32 %v381_v47, %v380_v3  ;;  %v177_v47 = vld [vmem:[%s3301_s3] sm:$0xf] }
  0x9f   : > { %664 = vmatmul.mubr.bf16.gmra.mrb[4].mxu1 %v430_v22  ;;  %v1000_v22 = vrot.slane %v998_v1, 1  ;;  %v438_v25 = vsel %vm422_vm2, %v433_v37, %v437_v7  ;;  %v441_v37 = vrot.slane %v3461_v27, 1  ;;  %v2911_v1 = vld [vmem:[#allocation5 + $0x3a4] ss:$8 sps:$4 sm:$0xff]  }
  0xa0   : > { %879 = vmatpush1.bf16.msra.mxu1 %v2852_v14  ;;  %1279 = vmatmul.mubr.bf16.gmra.mrb[4].mxu0 %v1045_v28  ;;  %v2878_v14 = vld [vmem:[#allocation5 + $0x60] ss:$8 sps:$4 sm:$0xff]   ;;  %v3452_v16 = vsel %vm337_vm0, %v372_v30, %v383_v8  ;;  %v2897_v30 = vld [vmem:[#allocation5 + $0x384] ss:$8 sps:$4 sm:$0xff]  }
  0xa1   : > { %1694 = vmatpush1.bf16.msra.mxu0 %v2855_v15  ;;  %880 = vmatprep.subr.bf16.mxu1 %v2860_v20  ;;  %v1055_v15 = vsel %vm422_vm2, %v1050_v42, %v1054_v6  ;;  %v1052_v20 = vrot.slane %v3402_v18, 1  ;;  %v443_v21 = vrot.slane %v3452_v16, 1  ;;  %v1001_v29 = vsel %vm229_vm1, %v996_v12, %v1000_v22  ;;  %v3465_v18 = vld [vmem:[%s3301_s3 + $0x34] ss:$0 sps:$4 sm:$0x11]  }
  0xa2   : > { %1695 = vmatprep.subr.bf16.mxu0 %v2863_v23  ;;  %673 = vmatprep.mubr.bf16.mxu1 %v436_v26  ;;  %v2886_v23 = vld [vmem:[#allocation5 + $0x74] ss:$8 sps:$4 sm:$0xff]   ;;  %v386_v28 = vshll.u32 %v3465_v18, 16  ;;  %v2894_v26 = vld [vmem:[#allocation5 + $0x84] ss:$8 sps:$4 sm:$0xff]  }
  0xa3   : > { %1288 = vmatprep.mubr.bf16.mxu0 %v1051_v54  ;;  %v1053_v34 = vsel %vm422_vm2, %v1048_v46, %v1052_v20  ;;  %v1353_v54 = vld [vmem:[%s3301_s3 + $0x8] sm:$0xe] }
  0xa4   : > { %881 = vmatpush1.bf16.msra.mxu1 %v2858_v63  ;;  %v1058_v63 = vrot.slane %v1001_v29, 1  ;;  %v388_v39 = vsel %vm337_vm0, %v380_v3, %v386_v28  ;;  %v3490_v57 = vcombine.low %v1353_v54, %v3487_v55  ;;  %v3499_v3 = vld [vmem:[%s3301_s3 + $0x10] sm:$0xff]   ;;  %v2937_v54 = vld [vmem:[#allocation5 + $0x3e0] ss:$8 sps:$4 sm:$0xff]  }
  0xa5   : > { %1696 = vmatpush1.bf16.msra.mxu0 %v2861_v31  ;;  %882 = vmatprep.subr.bf16.mxu1 %v2866_v35  ;;  %v1004_v31 = vor.u32 %v1002_v17, %v1000_v22  ;;  %v444_v35 = vsel %vm422_vm2, %v439_v62, %v443_v21  ;;  %v447_v46 = vrot.slane %v388_v39, 1  ;;  %v1057_v62 = vsel %vm422_vm2, %v1052_v20, %v1056_v38  ;;  %v2906_v17 = vld [vmem:[#allocation5 + $0xa0] ss:$8 sps:$4 sm:$0xff]  }
  0xa6   : > { %1697 = vmatprep.subr.bf16.mxu0 %v2869_v40  ;;  %v1059_v36 = vsel %vm422_vm2, %v1054_v6, %v1058_v63  ;;  %v2892_v40 = vld [vmem:[#allocation5 + $0x80] ss:$8 sps:$4 sm:$0xff]   ;;  %v1406_v6 = vshll.u32 %v3490_v57, 16  ;;  %v1060_v20 = vrot.slane %v3465_v18, 1 }
  0xa7   : > { %674 = vmatmul.mubr.bf16.gmra.mrb[8].mxu1 %v434_v45  ;;  %v1062_v42 = vrot.slane %v1004_v31, 1  ;;  %v2903_v45 = vld [vmem:[#allocation5 + $0x394] ss:$8 sps:$4 sm:$0xff]   ;;  %v448_v59 = vsel %vm422_vm2, %v443_v21, %v447_v46  ;;  %v2920_v39 = vld [vmem:[#allocation5 + $0xc0] ss:$8 sps:$4 sm:$0xff]  }
  0xa8   : > { %883 = vmatpush1.bf16.msra.mxu1 %v2864_v44  ;;  %1289 = vmatmul.mubr.bf16.gmra.mrb[8].mxu0 %v1049_v4  ;;  %v2900_v44 = vld [vmem:[#allocation5 + $0x94] ss:$8 sps:$4 sm:$0xff]   ;;  %v1061_v28 = vsel %vm422_vm2, %v1056_v38, %v1060_v20 }
  0xa9   : > { %1698 = vmatpush1.bf16.msra.mxu0 %v2867_v50  ;;  %884 = vmatprep.subr.bf16.mxu1 %v2872_v52  ;;  %v442_v50 = vsel %vm422_vm2, %v437_v7, %v441_v37  ;;  %v3483_v52 = vcombine.low %v177_v47, %v3312_v48  ;;  %v1063_v0 = vsel %vm422_vm2, %v1058_v63, %v1062_v42  ;;  %v3502_v4 = vld [vmem:[%s3301_s3 + $0x18] sm:$0xff]   ;;  %v2908_v7 = vld [vmem:[#allocation5 + $0xa4] ss:$8 sps:$4 sm:$0xff]  }
  0xaa   : > { %1699 = vmatprep.subr.bf16.mxu0 %v2875_v61  ;;  %683 = vmatprep.mubr.bf16.mxu1 %v440_v51  ;;  %v2898_v61 = vld [vmem:[#allocation5 + $0x90] ss:$8 sps:$4 sm:$0xff]   ;;  %v1419_v12 = vshll.u32 %v3502_v4, 16  ;;  %v2917_v63 = vld [vmem:[#allocation5 + $0x3b4] ss:$8 sps:$4 sm:$0xff]   ;;  %v1423_v46 = vshrl.u32 %v3502_v4, 16 }
  0xab   : > { %1298 = vmatprep.mubr.bf16.mxu0 %v1055_v15  ;;  %v233_v48 = vshll.u32 %v3483_v52, 16  ;;  %v2901_v51 = vld [vmem:[#allocation5 + $0x390] ss:$8 sps:$4 sm:$0xff]   ;;  %v231_v58 = vshrl.u32 %v3483_v52, 16  ;;  %v2928_v38 = vld [vmem:[#allocation5 + $0xd4] ss:$8 sps:$4 sm:$0xff]  }
  0xac   : > { %885 = vmatpush1.bf16.msra.mxu1 %v2870_v2  ;;  %v445_v2 = vrot.slane %v3475_v43, 1  ;;  %v1421_v16 = vrot.slane %v1419_v12, 1  ;;  %v2926_v42 = vld [vmem:[#allocation5 + $0xd0] ss:$8 sps:$4 sm:$0xff]  }
  0xad   : > { %1700 = vmatpush1.bf16.msra.mxu0 %v2873_v5  ;;  %886 = vmatprep.subr.bf16.mxu1 %v2880_v9  ;;  %v1404_v5 = vshrl.u32 %v3490_v57, 16  ;;  %v235_v8 = vrot.slane %v233_v48, 1  ;;  %v1411_v9 = vshll.u32 %v3499_v3, 16  ;;  %v2945_v48 = vld [vmem:[#allocation5 + $0x3f4] ss:$8 sps:$4 sm:$0xff]  }
  0xae   : > { %1701 = vmatprep.subr.bf16.mxu0 %v2883_v10  ;;  %v1415_v10 = vshrl.u32 %v3499_v3, 16 }
  0xaf   : > { %684 = vmatmul.mubr.bf16.gmra.mrb[12].mxu1 %v438_v25  ;;  %v1413_v15 = vrot.slane %v1411_v9, 1  ;;  %v236_v21 = vor.u32 %v235_v8, %v231_v58  ;;  %v446_v25 = vsel %vm422_vm2, %v441_v37, %v445_v2  ;;  %v2922_v37 = vld [vmem:[#allocation5 + $0xc4] ss:$8 sps:$4 sm:$0xff]   ;;  %v242_v58 = vshrl.u32 %v3356_v32, 16 }
  0xb0   : > { %887 = vmatpush1.bf16.msra.mxu1 %v2878_v14  ;;  %1299 = vmatmul.mubr.bf16.gmra.mrb[12].mxu0 %v1053_v34  ;;  %v1408_v14 = vrot.slane %v1406_v6, 1  ;;  %v3536_v2 = vld [vmem:[%s3301_s3 + $0x28] sm:$0xff]   ;;  %v2940_v6 = vld [vmem:[#allocation5 + $0xf0] ss:$8 sps:$4 sm:$0xff]   ;;  %v1491_v8 = vrot.slane %v3490_v57, 1 }
  0xb1   : > { %1702 = vmatpush1.bf16.msra.mxu0 %v2881_v11  ;;  %888 = vmatprep.subr.bf16.mxu1 %v2886_v23  ;;  %v3511_v11 = vrot.slane %v238_v49, 1  ;;  %v2909_v23 = vld [vmem:[#allocation5 + $0x3a0] ss:$8 sps:$4 sm:$0xff]   ;;  %v1417_v29 = vor.u32 %v1415_v10, %v1413_v15  ;;  %v2939_v49 = vld [vmem:[#allocation5 + $0x3e4] ss:$8 sps:$4 sm:$0xff]   ;;  %v1492_v10 = vrot.slane %v3499_v3, 1 }
  0xb2   : > { %1703 = vmatprep.subr.bf16.mxu0 %v2889_v24  ;;  %693 = vmatprep.mubr.bf16.mxu1 %v444_v35  ;;  %v1409_v22 = vor.u32 %v1408_v14, %v1404_v5  ;;  %v2914_v24 = vld [vmem:[#allocation5 + $0xb4] ss:$8 sps:$4 sm:$0xff]   ;;  %v2915_v35 = vld [vmem:[#allocation5 + $0x3b0] ss:$8 sps:$4 sm:$0xff]   ;;  %v246_v5 = vshll.u32 %v3381_v60, 16  ;;  %v1435_v14 = vshll.u32 %v3536_v2, 16 }
  0xb3   : > { %1308 = vmatprep.mubr.bf16.mxu0 %v1059_v36  ;;  %v3519_v34 = vsel %vm229_vm1, %v1417_v29, %v1421_v16  ;;  %v2952_v57 = vld [vmem:[#allocation5 + $0x404] ss:$8 sps:$4 sm:$0xff]   ;;  %v1493_v20 = vsel %vm422_vm2, %v1491_v8, %v1492_v10 }
  0xb4   : > { %889 = vmatpush1.bf16.msra.mxu1 %v2884_v33  ;;  %v1414_v31 = vsel %vm229_vm1, %v1409_v22, %v1413_v15  ;;  %v2912_v33 = vld [vmem:[#allocation5 + $0xb0] ss:$8 sps:$4 sm:$0xff]   ;;  %v1495_v36 = vrot.slane %v3519_v34, 1  ;;  %v244_v15 = vor.u32 %v242_v58, %v3511_v11  ;;  %v1437_v22 = vrot.slane %v1435_v14, 1  ;;  %v2959_v34 = vld [vmem:[#allocation5 + $0x424] ss:$8 sps:$4 sm:$0xff]  }
  0xb5   : > { %1704 = vmatpush1.bf16.msra.mxu0 %v2887_v13  ;;  %890 = vmatprep.subr.bf16.mxu1 %v2894_v26  ;;  %v1494_v18 = vrot.slane %v1414_v31, 1  ;;  %v241_v13 = vsel %vm229_vm1, %v236_v21, %v3511_v11  ;;  %v2925_v26 = vld [vmem:[#allocation5 + $0x3c4] ss:$8 sps:$4 sm:$0xff]  }
  0xb6   : > { %1705 = vmatprep.subr.bf16.mxu0 %v2897_v30 }
  0xb7   : > { %694 = vmatmul.mubr.bf16.gmra.mrb[16].mxu1 %v442_v50  ;;  %v1496_v30 = vsel %vm422_vm2, %v1494_v18, %v1495_v36  ;;  %v2934_v50 = vld [vmem:[#allocation5 + $0xe0] ss:$8 sps:$4 sm:$0xff]  }
  0xb8   : > { %891 = vmatpush1.bf16.msra.mxu1 %v2892_v40  ;;  %1309 = vmatmul.mubr.bf16.gmra.mrb[16].mxu0 %v1057_v62  ;;  %v3531_v40 = vld [vmem:[%s3301_s3 + $0x20] sm:$0xff]   ;;  %v1425_v62 = vor.u32 %v1423_v46, %v1421_v16  ;;  %v248_v16 = vrot.slane %v246_v5, 1 }
  0xb9   : > { %1706 = vmatpush1.bf16.msra.mxu0 %v2895_v53  ;;  %892 = vmatprep.subr.bf16.mxu1 %v2900_v44  ;;  %v2931_v53 = vld [vmem:[#allocation5 + $0x3d4] ss:$8 sps:$4 sm:$0xff]   ;;  %v2929_v44 = vld [vmem:[#allocation5 + $0x3d0] ss:$8 sps:$4 sm:$0xff]   ;;  %v1427_v47 = vshll.u32 %v3531_v40, 16 }
  0xba   : > { %1707 = vmatprep.subr.bf16.mxu0 %v2903_v45  ;;  %703 = vmatprep.mubr.bf16.mxu1 %v448_v59  ;;  %v2936_v45 = vld [vmem:[#allocation5 + $0xe4] ss:$8 sps:$4 sm:$0xff]   ;;  %v1847_v59 = vrot.slane %v3502_v4, 2  ;;  %v249_v11 = vsel %vm229_vm1, %v244_v15, %v248_v16  ;;  %v2967_v15 = vld [vmem:[#allocation5 + $0x450] ss:$8 sps:$4 sm:$0xff]  }
  0xbb   : > { %1318 = vmatprep.mubr.bf16.mxu0 %v1063_v0  ;;  %v1429_v0 = vrot.slane %v1427_v47, 1  ;;  %v258_v47 = vshrl.u32 %v3405_v19, 16 }
  0xbc   : > { %893 = vmatpush1.bf16.msra.mxu1 %v2898_v61  ;;  %v2942_v61 = vld [vmem:[#allocation5 + $0xf4] ss:$8 sps:$4 sm:$0xff]  }
  0xbd   : > { %1708 = vmatpush1.bf16.msra.mxu0 %v2901_v51  ;;  %894 = vmatprep.subr.bf16.mxu1 %v2908_v7  ;;  %v1845_v51 = vrot.slane %v3499_v3, 2  ;;  %v2943_v7 = vld [vmem:[#allocation5 + $0x3f0] ss:$8 sps:$4 sm:$0xff]   ;;  %v1430_v12 = vsel %vm229_vm1, %v1425_v62, %v1429_v0  ;;  %v2950_v3 = vld [vmem:[#allocation5 + $0x400] ss:$8 sps:$4 sm:$0xff]  }
  0xbe   : > { %1709 = vmatprep.subr.bf16.mxu0 %v2911_v1  ;;  %v1431_v1 = vshrl.u32 %v3531_v40, 16 }
  0xbf   : > { %704 = vmatmul.mubr.bf16.gmra.mrb[20].mxu1 %v446_v25  ;;  %v3546_v9 = vsel %vm1843_vm3, %v1845_v51, %v1847_v59  ;;  %v2955_v25 = vld [vmem:[#allocation5 + $0x414] ss:$8 sps:$4 sm:$0xff]  }
  0xc0   : > { %895 = vmatpush1.bf16.msra.mxu1 %v2906_v17  ;;  %1319 = vmatmul.mubr.bf16.gmra.mrb[20].mxu0 %v1061_v28  ;;  %v1499_v17 = vrot.slane %v1430_v12, 1  ;;  %v1433_v21 = vor.u32 %v1431_v1, %v1429_v0  ;;  %v1497_v28 = vrot.slane %v3502_v4, 1  ;;  %v2966_v0 = vld [vmem:[#allocation5 + $0x444] ss:$8 sps:$4 sm:$0xff]   ;;  %v266_v12 = vshrl.u32 %v3440_v56, 16 }
  0xc1   : > { %1710 = vmatpush1.bf16.msra.mxu0 %v2909_v23  ;;  %896 = vmatprep.subr.bf16.mxu1 %v2914_v24  ;;  %v3555_v23 = vld [vmem:[%s3301_s3 + $0x30] sm:$0xff]   ;;  %v1806_v24 = vld [vmem:[%s3301_s3 + $0x8] sm:$0xc]  ;;  %v270_v1 = vshll.u32 %v3461_v27, 16 }
  0xc2   : > { %1711 = vmatprep.subr.bf16.mxu0 %v2917_v63  ;;  %906 = vmatprep.mubr.bf16.mxu1 %v241_v13  ;;  %v2484_v29 = vcombine.low %v1806_v24, %v3487_v55  ;;  %v250_v63 = vshrl.u32 %v3381_v60, 16  ;;  %v1500_v31 = vsel %vm422_vm2, %v1495_v36, %v1499_v17  ;;  %v1438_v55 = vsel %vm229_vm1, %v1433_v21, %v1437_v22 }
  0xc3   : > { %1721 = vmatprep.mubr.bf16.mxu0 %v1496_v30  ;;  %v1439_v13 = vshrl.u32 %v3536_v2, 16  ;;  %v1503_v30 = vrot.slane %v1438_v55, 1  ;;  %v1447_v62 = vshrl.u32 %v3555_v23, 16  ;;  %v272_v21 = vrot.slane %v270_v1, 1  ;;  %v2980_v55 = vld [vmem:[#allocation5 + $0x484] ss:$8 sps:$4 sm:$0xff]  }
  0xc4   : > { %897 = vmatpush1.bf16.msra.mxu1 %v2912_v33  ;;  %v254_v33 = vshll.u32 %v3405_v19, 16  ;;  %v1844_v18 = vrot.slane %v2484_v29, 2  ;;  %v2976_v29 = vld [vmem:[#allocation5 + $0x474] ss:$8 sps:$4 sm:$0xff]  }
  0xc5   : > { %1712 = vmatpush1.bf16.msra.mxu0 %v2915_v35  ;;  %898 = vmatprep.subr.bf16.mxu1 %v2922_v37  ;;  %v2953_v35 = vld [vmem:[#allocation5 + $0x410] ss:$8 sps:$4 sm:$0xff]   ;;  %v252_v37 = vor.u32 %v250_v63, %v248_v16  ;;  %v1504_v46 = vsel %vm422_vm2, %v1499_v17, %v1503_v30  ;;  %v1505_v16 = vrot.slane %v3536_v2, 1 }
  0xc6   : > { %1713 = vmatprep.subr.bf16.mxu0 %v2925_v26  ;;  %v3571_v36 = vsel %vm1843_vm3, %v1844_v18, %v1845_v51  ;;  %v256_v26 = vrot.slane %v254_v33, 1  ;;  %v278_v33 = vshll.u32 %v3475_v43, 16  ;;  %v2978_v43 = vld [vmem:[#allocation5 + $0x480] ss:$8 sps:$4 sm:$0xff]  }
  0xc8   : > { %899 = vmatpush1.bf16.msra.mxu1 %v2920_v39  ;;  %v1498_v39 = vsel %vm422_vm2, %v1492_v10, %v1497_v28  ;;  %v2969_v10 = vld [vmem:[#allocation5 + $0x454] ss:$8 sps:$4 sm:$0xff]  }
  0xc9   : > { %1714 = vmatpush1.bf16.msra.mxu0 %v2923_v41  ;;  %900 = vmatprep.subr.bf16.mxu1 %v2928_v38  ;;  %v2957_v41 = vld [vmem:[#allocation5 + $0x420] ss:$8 sps:$4 sm:$0xff]   ;;  %v1441_v38 = vor.u32 %v1439_v13, %v1437_v22  ;;  %v280_v13 = vrot.slane %v278_v33, 1 }
  0xca   : > { %1715 = vmatprep.subr.bf16.mxu0 %v2931_v53 }
  0xcc   : > { %901 = vmatpush1.bf16.msra.mxu1 %v2926_v42  ;;  %v3575_v42 = vld [vmem:[%s3301_s3 + $0x38] ss:$0 sps:$4 sm:$0x33]  }
  0xcd   : > { %1716 = vmatpush1.bf16.msra.mxu0 %v2929_v44  ;;  %902 = vmatprep.subr.bf16.mxu1 %v2936_v45  ;;  %v2962_v44 = vld [vmem:[#allocation5 + $0x434] ss:$8 sps:$4 sm:$0xff]   ;;  %v257_v45 = vsel %vm229_vm1, %v252_v37, %v256_v26  ;;  %v1455_v22 = vshrl.u32 %v3575_v42, 16  ;;  %v2984_v37 = vld [vmem:[%s3301_s3 + $0x38] ss:$0 sps:$4 sm:$0x11]  }
  0xce   : > { %1717 = vmatprep.subr.bf16.mxu0 %v2939_v49  ;;  %v262_v49 = vshll.u32 %v3440_v56, 16 }
  0xd0   : > { %903 = vmatpush1.bf16.msra.mxu1 %v2934_v50  ;;  %v2960_v50 = vld [vmem:[#allocation5 + $0x430] ss:$8 sps:$4 sm:$0xff]   ;;  %v264_v51 = vrot.slane %v262_v49, 1 }
  0xd1   : > { %1718 = vmatpush1.bf16.msra.mxu0 %v2937_v54  ;;  %904 = vmatprep.subr.bf16.mxu1 %v2942_v61  ;;  %v1501_v54 = vrot.slane %v3531_v40, 1 }
  0xd2   : > { %1719 = vmatprep.subr.bf16.mxu0 %v2945_v48  ;;  %v260_v48 = vor.u32 %v258_v47, %v256_v26  ;;  %v2983_v26 = vld [vmem:[#allocation5 + $0x494] ss:$8 sps:$4 sm:$0xff]  }
  0xd3   : > { %v1502_v5 = vsel %vm422_vm2, %v1497_v28, %v1501_v54  ;;  %v1506_v24 = vsel %vm422_vm2, %v1501_v54, %v1505_v16  ;;  %v1509_v28 = vrot.slane %v3555_v23, 1  ;;  %v2990_v47 = vld [vmem:[#allocation5 + $0x4b4] ss:$8 sps:$4 sm:$0xff]  }
  0xd4   : > { %905 = vmatpush1.bf16.msra.mxu1 %v2940_v6  ;;  %v2964_v6 = vld [vmem:[#allocation5 + $0x440] ss:$8 sps:$4 sm:$0xff]   ;;  %v265_v14 = vsel %vm229_vm1, %v260_v48, %v264_v51  ;;  %v2996_v54 = vld [vmem:[#allocation5 + $0x4d4] ss:$8 sps:$4 sm:$0xff]   ;;  %v1853_v48 = vrot.slane %v3555_v23, 2 }
  0xd5   : > { %1720 = vmatpush1.bf16.msra.mxu0 %v2943_v7  ;;  %2545 = vmatprep.subr.bf16.mxu1 %v2952_v57 }
  0xd6   : > { %2023 = vmatprep.subr.bf16.mxu0 %v2952_v57 }
  0xd7   : > { %907 = vmatmul.mubr.bf16.vlgmr.msra.gmra.mrb[0].mxu1 %v3483_v52  ;;  %v1443_v52 = vshll.u32 %v3555_v23, 16 }
  0xd8   : > { %1722 = vmatmul.mubr.bf16.vlgmr.msra.gmra.mrb[0].mxu0 %v1493_v20  ;;  %2561 = vmatpush1.bf16.msra.mxu1 %v2950_v3  ;;  %v2973_v20 = vld [vmem:[#allocation5 + $0x464] ss:$8 sps:$4 sm:$0xff]  }
  0xd9   : > { %2024 = vmatpush1.bf16.msra.mxu0 %v2950_v3  ;;  %2546 = vmatprep.subr.bf16.mxu1 %v2955_v25  ;;  %v1445_v53 = vrot.slane %v1443_v52, 1  ;;  %v268_v3 = vor.u32 %v266_v12, %v264_v51 }
  0xda   : > { %2025 = vmatprep.subr.bf16.mxu0 %v2955_v25  ;;  %916 = vmatprep.mubr.bf16.mxu1 %v249_v11  ;;  %v2971_v25 = vld [vmem:[#allocation5 + $0x460] ss:$8 sps:$4 sm:$0xff]  }
  0xdb   : > { %1731 = vmatprep.mubr.bf16.mxu0 %v1500_v31  ;;  %v1446_v61 = vsel %vm229_vm1, %v1441_v38, %v1445_v53  ;;  %v1449_v7 = vor.u32 %v1447_v62, %v1445_v53  ;;  %v273_v63 = vsel %vm229_vm1, %v268_v3, %v272_v21  ;;  %v274_v31 = vshrl.u32 %v3461_v27, 16  ;;  %v2987_v53 = vld [vmem:[#allocation5 + $0x4a4] ss:$8 sps:$4 sm:$0xff]   ;;  %v2997_v62 = vld [vmem:[#allocation5 + $0x4e0] ss:$8 sps:$4 sm:$0xff]  }
  0xdc   : > { %2562 = vmatpush1.bf16.msra.mxu1 %v2953_v35  ;;  %v1507_v58 = vrot.slane %v1446_v61, 1  ;;  %v1513_v38 = vrot.slane %v2984_v37, 1  ;;  %v2999_v61 = vld [vmem:[#allocation5 + $0x4e4] ss:$8 sps:$4 sm:$0xff]  }
  0xdd   : > { %2026 = vmatpush1.bf16.msra.mxu0 %v2953_v35  ;;  %2547 = vmatprep.subr.bf16.mxu1 %v2959_v34  ;;  %v2974_v35 = vld [vmem:[#allocation5 + $0x470] ss:$8 sps:$4 sm:$0xff]  }
  0xde   : > { %2027 = vmatprep.subr.bf16.mxu0 %v2959_v34  ;;  %v1508_v57 = vsel %vm422_vm2, %v1503_v30, %v1507_v58  ;;  %v1510_v34 = vsel %vm422_vm2, %v1505_v16, %v1509_v28 }
  0xdf   : > { %917 = vmatmul.mubr.bf16.gmra.mrb[4].mxu1 %v3356_v32  ;;  %v1451_v32 = vshll.u32 %v3575_v42, 16 }
  0xe0   : > { %1732 = vmatmul.mubr.bf16.gmra.mrb[4].mxu0 %v1498_v39  ;;  %2563 = vmatpush1.bf16.msra.mxu1 %v2957_v41 }
  0xe1   : > { %2028 = vmatpush1.bf16.msra.mxu0 %v2957_v41  ;;  %2548 = vmatprep.subr.bf16.mxu1 %v2962_v44  ;;  %v1453_v8 = vrot.slane %v1451_v32, 1  ;;  %v2981_v41 = vld [vmem:[#allocation5 + $0x490] ss:$8 sps:$4 sm:$0xff]   ;;  %v3002_v32 = vld [vmem:[#allocation5 + $0x4f4] ss:$8 sps:$4 sm:$0xff]  }
  0xe2   : > { %2029 = vmatprep.subr.bf16.mxu0 %v2962_v44  ;;  %926 = vmatprep.mubr.bf16.mxu1 %v257_v45  ;;  %v1849_v44 = vrot.slane %v3531_v40, 2  ;;  %v1851_v45 = vrot.slane %v3536_v2, 2  ;;  %v2993_v40 = vld [vmem:[#allocation5 + $0x4c4] ss:$8 sps:$4 sm:$0xff]   ;;  %v2991_v2 = vld [vmem:[#allocation5 + $0x4c0] ss:$8 sps:$4 sm:$0xff]  }
  0xe3   : > { %1741 = vmatprep.mubr.bf16.mxu0 %v1504_v46  ;;  %v1454_v17 = vsel %vm229_vm1, %v1449_v7, %v1453_v8  ;;  %v1457_v18 = vor.u32 %v1455_v22, %v1453_v8  ;;  %v2985_v46 = vld [vmem:[#allocation5 + $0x4a0] ss:$8 sps:$4 sm:$0xff]  }
  0xe4   : > { %2564 = vmatpush1.bf16.msra.mxu1 %v2960_v50  ;;  %v1852_v49 = vsel %vm1843_vm3, %v1849_v44, %v1851_v45  ;;  %v1854_v51 = vsel %vm1843_vm3, %v1851_v45, %v1853_v48 }
  0xe5   : > { %2030 = vmatpush1.bf16.msra.mxu0 %v2960_v50  ;;  %2549 = vmatprep.subr.bf16.mxu1 %v2966_v0  ;;  %v1515_v52 = vrot.slane %v1457_v18, 1  ;;  %v2988_v50 = vld [vmem:[#allocation5 + $0x4b0] ss:$8 sps:$4 sm:$0xff]  }
  0xe6   : > { %2031 = vmatprep.subr.bf16.mxu0 %v2966_v0  ;;  %v3000_v0 = vld [vmem:[#allocation5 + $0x4f0] ss:$8 sps:$4 sm:$0xff]  }
  0xe7   : > { %927 = vmatmul.mubr.bf16.gmra.mrb[8].mxu1 %v3381_v60  ;;  %v1511_v60 = vrot.slane %v1454_v17, 1 }
  0xe8   : > { %1742 = vmatmul.mubr.bf16.gmra.mrb[8].mxu0 %v1502_v5  ;;  %2565 = vmatpush1.bf16.msra.mxu1 %v2964_v6  ;;  %v1850_v5 = vsel %vm1843_vm3, %v1847_v59, %v1849_v44 }
  0xe9   : > { %2032 = vmatpush1.bf16.msra.mxu0 %v2964_v6  ;;  %2550 = vmatprep.subr.bf16.mxu1 %v2969_v10  ;;  %v1512_v11 = vsel %vm422_vm2, %v1507_v58, %v1511_v60  ;;  %v1516_v39 = vsel %vm422_vm2, %v1511_v60, %v1515_v52  ;;  %v1855_v58 = vrot.slane %v3575_v42, 2 }
  0xea   : > { %2033 = vmatprep.subr.bf16.mxu0 %v2969_v10  ;;  %936 = vmatprep.mubr.bf16.mxu1 %v265_v14 }
  0xeb   : > { %1751 = vmatprep.mubr.bf16.mxu0 %v1508_v57  ;;  %v1856_v6 = vsel %vm1843_vm3, %v1853_v48, %v1855_v58 }
  0xec   : > { %2566 = vmatpush1.bf16.msra.mxu1 %v2967_v15 }
  0xed   : > { %2034 = vmatpush1.bf16.msra.mxu0 %v2967_v15  ;;  %2551 = vmatprep.subr.bf16.mxu1 %v2973_v20 }
  0xee   : > { %2035 = vmatprep.subr.bf16.mxu0 %v2973_v20 }
  0xef   : > { %937 = vmatmul.mubr.bf16.gmra.mrb[12].mxu1 %v3405_v19  ;;  %v276_v19 = vor.u32 %v274_v31, %v272_v21 }
  0xf0   : > { %1752 = vmatmul.mubr.bf16.gmra.mrb[12].mxu0 %v1506_v24  ;;  %2567 = vmatpush1.bf16.msra.mxu1 %v2971_v25 }
  0xf1   : > { %2036 = vmatpush1.bf16.msra.mxu0 %v2971_v25  ;;  %2552 = vmatprep.subr.bf16.mxu1 %v2976_v29  ;;  %v281_v30 = vsel %vm229_vm1, %v276_v19, %v280_v13 }
  0xf2   : > { %2037 = vmatprep.subr.bf16.mxu0 %v2976_v29  ;;  %946 = vmatprep.mubr.bf16.mxu1 %v273_v63 }
  0xf3   : > { %1761 = vmatprep.mubr.bf16.mxu0 %v1512_v11 }
  0xf4   : > { %2568 = vmatpush1.bf16.msra.mxu1 %v2974_v35 }
  0xf5   : > { %2038 = vmatpush1.bf16.msra.mxu0 %v2974_v35  ;;  %2553 = vmatprep.subr.bf16.mxu1 %v2980_v55 }
  0xf6   : > { %2039 = vmatprep.subr.bf16.mxu0 %v2980_v55 }
  0xf7   : > { %947 = vmatmul.mubr.bf16.gmra.mrb[16].mxu1 %v3440_v56  ;;  %v1514_v56 = vsel %vm422_vm2, %v1509_v28, %v1513_v38 }
  0xf8   : > { %1762 = vmatmul.mubr.bf16.gmra.mrb[16].mxu0 %v1510_v34  ;;  %2569 = vmatpush1.bf16.msra.mxu1 %v2978_v43 }
  0xf9   : > { %2040 = vmatpush1.bf16.msra.mxu0 %v2978_v43  ;;  %2554 = vmatprep.subr.bf16.mxu1 %v2983_v26 }
  0xfa   : > { %2041 = vmatprep.subr.bf16.mxu0 %v2983_v26  ;;  %956 = vmatprep.mubr.bf16.mxu1 %v281_v30 }
  0xfb   : > { %1771 = vmatprep.mubr.bf16.mxu0 %v1516_v39 }
  0xfc   : > { %2570 = vmatpush1.bf16.msra.mxu1 %v2981_v41 }
  0xfd   : > { %2042 = vmatpush1.bf16.msra.mxu0 %v2981_v41  ;;  %2555 = vmatprep.subr.bf16.mxu1 %v2987_v53 }
  0xfe   : > { %2043 = vmatprep.subr.bf16.mxu0 %v2987_v53 }
  0xff   : > { %957 = vmatmul.mubr.bf16.gmra.mrb[20].mxu1 %v3461_v27  ;;  %v2994_v27 = vld [vmem:[#allocation5 + $0x4d0] ss:$8 sps:$4 sm:$0xff]  }
 0x100   : > { %1772 = vmatmul.mubr.bf16.gmra.mrb[20].mxu0 %v1514_v56  ;;  %2571 = vmatpush1.bf16.msra.mxu1 %v2985_v46 }
 0x101   : > { %2044 = vmatpush1.bf16.msra.mxu0 %v2985_v46  ;;  %2556 = vmatprep.subr.bf16.mxu1 %v2990_v47 }
 0x102   : > { %2045 = vmatprep.subr.bf16.mxu0 %v2990_v47  ;;  %2055 = vmatprep.mubr.bf16.mxu0 %v3571_v36 }
 0x103   : > { %2085 = vmatprep.mubr.bf16.mxu1 %v1852_v49 }
 0x104   : > { %2572 = vmatpush1.bf16.msra.mxu1 %v2988_v50 }
 0x105   : > { %2046 = vmatpush1.bf16.msra.mxu0 %v2988_v50  ;;  %2557 = vmatprep.subr.bf16.mxu1 %v2993_v40 }
 0x106   : > { %2047 = vmatprep.subr.bf16.mxu0 %v2993_v40 }
 0x108   : > { %2573 = vmatpush1.bf16.msra.mxu1 %v2991_v2 }
 0x109   : > { %2048 = vmatpush1.bf16.msra.mxu0 %v2991_v2  ;;  %2558 = vmatprep.subr.bf16.mxu1 %v2996_v54 }
 0x10a   : > { %2049 = vmatprep.subr.bf16.mxu0 %v2996_v54 }
 0x10c   : > { %2574 = vmatpush1.bf16.msra.mxu1 %v2994_v27 }
 0x10d   : > { %2050 = vmatpush1.bf16.msra.mxu0 %v2994_v27  ;;  %2559 = vmatprep.subr.bf16.mxu1 %v2999_v61 }
 0x10e   : > { %2051 = vmatprep.subr.bf16.mxu0 %v2999_v61 }
 0x110   : > { %2575 = vmatpush1.bf16.msra.mxu1 %v2997_v62 }
 0x111   : > { %2052 = vmatpush1.bf16.msra.mxu0 %v2997_v62  ;;  %2560 = vmatprep.subr.bf16.mxu1 %v3002_v32 }
 0x112   : > { %2053 = vmatprep.subr.bf16.mxu0 %v3002_v32 }
 0x114   : > { %2576 = vmatpush1.bf16.msra.mxu1 %v3000_v0 }
 0x115   : > { %2054 = vmatpush1.bf16.msra.mxu0 %v3000_v0 }
 0x117   : > { %2086 = vmatmul.mubr.bf16.vlgmr.msra.gmra.mrb[24].mxu1 %v1852_v49 }
 0x118   : > { %2056 = vmatmul.mubr.bf16.vlgmr.msra.gmra.mrb[0].mxu0 %v3571_v36  ;;  %2095 = vmatprep.mubr.bf16.mxu1 %v1854_v51 }
 0x119   : > { %2065 = vmatprep.mubr.bf16.mxu0 %v3546_v9 }
 0x11f   : > { %2096 = vmatmul.mubr.bf16.gmra.mrb[28].mxu1 %v1854_v51 }
 0x120   : > { %2066 = vmatmul.mubr.bf16.gmra.mrb[4].mxu0 %v3546_v9  ;;  %2105 = vmatprep.mubr.bf16.mxu1 %v1856_v6 }
 0x121   : > { %2075 = vmatprep.mubr.bf16.mxu0 %v1850_v5 }
 0x127   : > { %2106 = vmatmul.mubr.bf16.gmra.mrb[32].mxu1 %v1856_v6 }
 0x128   : > { %2076 = vmatmul.mubr.bf16.gmra.mrb[8].mxu0 %v1850_v5 }
 0x1aa   : > { %v908_v23 = vpop.f32.mrb[0].mxu1 }
 0x1ab   : > { %v910_v36 = vpop.f32.mrb[1].mxu1 }
 0x1ac   : > { %v912_v7 = vpop.f32.mrb[2].mxu1 }
 0x1ad   : > { %v914_v8 = vpop.f32.mrb[3].mxu1 }
 0x1b2   : > { %v3623_v10 = vpop.f32.mrb[4].mxu1 }
 0x1b3   : > { %v3625_v42 = vpop.f32.mrb[5].mxu1 }
 0x1b4   : > { %v3627_v4 = vpop.f32.mrb[6].mxu1 }
 0x1b5   : > { %v3629_v59 = vpop.f32.mrb[7].mxu1 }
 0x1ba   : > { %v3631_v12 = vpop.f32.mrb[8].mxu1 }
 0x1bb   : > { %v3633_v9 = vpop.f32.mrb[9].mxu1 }
 0x1bc   : > { %v3635_v1 = vpop.f32.mrb[10].mxu1 }
 0x1bd   : > { %v3637_v14 = vpop.f32.mrb[11].mxu1 }
 0x1c2   : > { %v938_v57 = vpop.f32.mrb[12].mxu1 }
 0x1c3   : > { %v1753_v15 = vpop.f32.mrb[12].mxu0  ;;  %v940_v17 = vpop.f32.mrb[13].mxu1 }
 0x1c4   : > { %v2589_v16 = vadd.f32 %v1753_v15, %v938_v57  ;;  %v1755_v20 = vpop.f32.mrb[13].mxu0  ;;  %v942_v21 = vpop.f32.mrb[14].mxu1 }
 0x1c5   : > { %v2591_v3 = vadd.f32 %v1755_v20, %v940_v17  ;;  %v1757_v60 = vpop.f32.mrb[14].mxu0  ;;  %v944_v24 = vpop.f32.mrb[15].mxu1 }
 0x1c6   : > { %v2593_v22 = vadd.f32 %v1757_v60, %v942_v21  ;;  %v1759_v25 = vpop.f32.mrb[15].mxu0 }
 0x1c7   : > { %v2595_v29 = vadd.f32 %v1759_v25, %v944_v24 }
 0x1ca   : > { %v948_v63 = vpop.f32.mrb[16].mxu1 }
 0x1cb   : > { %v1763_v11 = vpop.f32.mrb[16].mxu0  ;;  %v950_v33 = vpop.f32.mrb[17].mxu1 }
 0x1cc   : > { %v2597_v31 = vadd.f32 %v1763_v11, %v948_v63  ;;  %v1765_v18 = vpop.f32.mrb[17].mxu0  ;;  %v952_v28 = vpop.f32.mrb[18].mxu1 }
 0x1cd   : > { %v2599_v35 = vadd.f32 %v1765_v18, %v950_v33  ;;  %v1767_v55 = vpop.f32.mrb[18].mxu0  ;;  %v954_v13 = vpop.f32.mrb[19].mxu1 }
 0x1ce   : > { %v2601_v19 = vadd.f32 %v1767_v55, %v952_v28  ;;  %v1769_v52 = vpop.f32.mrb[19].mxu0 }
 0x1cf   : > { %v2603_v34 = vadd.f32 %v1769_v52, %v954_v13 }
 0x1d2   : > { %v958_v43 = vpop.f32.mrb[20].mxu1 }
 0x1d3   : > { %v1773_v37 = vpop.f32.mrb[20].mxu0  ;;  %v960_v30 = vpop.f32.mrb[21].mxu1 }
 0x1d4   : > { %v3639_v26 = vadd.f32 %v1773_v37, %v958_v43  ;;  %v1775_v39 = vpop.f32.mrb[21].mxu0  ;;  %v962_v38 = vpop.f32.mrb[22].mxu1 }
 0x1d5   : > { %v3641_v41 = vadd.f32 %v1775_v39, %v960_v30  ;;  %v1777_v53 = vpop.f32.mrb[22].mxu0  ;;  %v964_v45 = vpop.f32.mrb[23].mxu1 }
 0x1d6   : > { %v3643_v44 = vadd.f32 %v1777_v53, %v962_v38  ;;  %v1779_v56 = vpop.f32.mrb[23].mxu0 }
 0x1d7   : > { %v3645_v46 = vadd.f32 %v1779_v56, %v964_v45 }
 0x1ea   : > { %v2087_v49 = vpop.f32.mrb[24].mxu1 }
 0x1eb   : > { %v2057_v47 = vpop.f32.mrb[0].mxu0  ;;  %v2590_v40 = vadd.f32 %v2589_v16, %v2087_v49  ;;  %v2089_v54 = vpop.f32.mrb[25].mxu1 }
 0x1ec   : > { %v2577_v50 = vadd.f32 %v2057_v47, %v908_v23  ;;  %v2059_v2 = vpop.f32.mrb[1].mxu0  ;;  %v2592_v61 = vadd.f32 %v2591_v3, %v2089_v54  ;;  %v2091_v32 = vpop.f32.mrb[26].mxu1 }
 0x1ed   : > { %v2578_v27 = vadd.f32 %v2059_v2, %v910_v36  ;;  %v2061_v62 = vpop.f32.mrb[2].mxu0  ;;  %v2594_v48 = vadd.f32 %v2593_v22, %v2091_v32  ;;  %v2093_v58 = vpop.f32.mrb[27].mxu1 }
 0x1ee   : > { %v2579_v0 = vadd.f32 %v2061_v62, %v912_v7  ;;  %v2063_v51 = vpop.f32.mrb[3].mxu0  ;;  %v2539_v6 = vpack.c.bf16 %v2592_v61, %v2590_v40  ;;  %v2596_v15 = vadd.f32 %v2595_v29, %v2093_v58 }
 0x1ef   : > { %v2533_v5 = vpack.c.bf16 %v2578_v27, %v2577_v50  ;;  %v2580_v57 = vadd.f32 %v2063_v51, %v914_v8 }
 0x1f0   : > { %2218 = vst [vmem:[%s3648_s17 + $0x30] sm:$0xff] %v2539_v6  ;;  %v2540_v36 = vpack.c.bf16 %v2596_v15, %v2594_v48 }
 0x1f1   : > { %2212 = vst [vmem:[%s3648_s17] sm:$0xff] %v2533_v5  ;;  %v2534_v23 = vpack.c.bf16 %v2580_v57, %v2579_v0 }
 0x1f2   : > { %2219 = vst [vmem:[%s3648_s17 + $0x38] sm:$0xff] %v2540_v36  ;;  %v2097_v16 = vpop.f32.mrb[28].mxu1 }
 0x1f3   : > { %2213 = vst [vmem:[%s3648_s17 + $0x8] sm:$0xff] %v2534_v23  ;;  %v2067_v7 = vpop.f32.mrb[4].mxu0  ;;  %v2598_v20 = vadd.f32 %v2597_v31, %v2097_v16  ;;  %v2099_v3 = vpop.f32.mrb[29].mxu1 }
 0x1f4   : > { %v2581_v17 = vadd.f32 %v2067_v7, %v3623_v10  ;;  %v2069_v8 = vpop.f32.mrb[5].mxu0  ;;  %v2600_v60 = vadd.f32 %v2599_v35, %v2099_v3  ;;  %v2101_v24 = vpop.f32.mrb[30].mxu1 }
 0x1f5   : > { %v2582_v21 = vadd.f32 %v2069_v8, %v3625_v42  ;;  %v2071_v22 = vpop.f32.mrb[6].mxu0  ;;  %v2602_v29 = vadd.f32 %v2601_v19, %v2101_v24  ;;  %v2103_v11 = vpop.f32.mrb[31].mxu1 }
 0x1f6   : > { %v2583_v25 = vadd.f32 %v2071_v22, %v3627_v4  ;;  %v2073_v63 = vpop.f32.mrb[7].mxu0  ;;  %v2541_v10 = vpack.c.bf16 %v2600_v60, %v2598_v20  ;;  %v2604_v18 = vadd.f32 %v2603_v34, %v2103_v11 }
 0x1f7   : > { %v2535_v33 = vpack.c.bf16 %v2582_v21, %v2581_v17  ;;  %v2584_v31 = vadd.f32 %v2073_v63, %v3629_v59 }
 0x1f8   : > { %2220 = vst [vmem:[%s3648_s17 + $0x40] sm:$0xff] %v2541_v10  ;;  %v2542_v28 = vpack.c.bf16 %v2604_v18, %v2602_v29 }
 0x1f9   : > { %2214 = vst [vmem:[%s3648_s17 + $0x10] sm:$0xff] %v2535_v33  ;;  %v2536_v42 = vpack.c.bf16 %v2584_v31, %v2583_v25 }
 0x1fa   : > { %2221 = vst [vmem:[%s3648_s17 + $0x48] sm:$0xff] %v2542_v28  ;;  %v2107_v55 = vpop.f32.mrb[32].mxu1 }
 0x1fb   : > { %2215 = vst [vmem:[%s3648_s17 + $0x18] sm:$0xff] %v2536_v42  ;;  %v2077_v35 = vpop.f32.mrb[8].mxu0  ;;  %v2606_v19 = vadd.f32 %v3639_v26, %v2107_v55  ;;  %v2109_v52 = vpop.f32.mrb[33].mxu1 }
 0x1fc   : > { %v2585_v4 = vadd.f32 %v2077_v35, %v3631_v12  ;;  %v2079_v13 = vpop.f32.mrb[9].mxu0  ;;  %v2608_v34 = vadd.f32 %v3641_v41, %v2109_v52  ;;  %v2111_v37 = vpop.f32.mrb[34].mxu1 }
 0x1fd   : > { %v2586_v59 = vadd.f32 %v2079_v13, %v3633_v9  ;;  %v2081_v43 = vpop.f32.mrb[10].mxu0  ;;  %v2610_v12 = vadd.f32 %v3643_v44, %v2111_v37  ;;  %v2113_v39 = vpop.f32.mrb[35].mxu1 }
 0x1fe   : > { %v2587_v30 = vadd.f32 %v2081_v43, %v3635_v1  ;;  %v2083_v26 = vpop.f32.mrb[11].mxu0  ;;  %v2543_v53 = vpack.c.bf16 %v2608_v34, %v2606_v19  ;;  %v2612_v45 = vadd.f32 %v3645_v46, %v2113_v39 }
 0x1ff   : > { %v2537_v38 = vpack.c.bf16 %v2586_v59, %v2585_v4  ;;  %v2588_v9 = vadd.f32 %v2083_v26, %v3637_v14 }
 0x200   : > { %2222 = vst [vmem:[%s3648_s17 + $0x50] sm:$0xff] %v2543_v53  ;;  %v2544_v41 = vpack.c.bf16 %v2612_v45, %v2610_v12 }
 0x201   : > { %2216 = vst [vmem:[%s3648_s17 + $0x20] sm:$0xff] %v2537_v38  ;;  %v2538_v1 = vpack.c.bf16 %v2588_v9, %v2587_v30 }
 0x202   : > { %2223 = vst [vmem:[%s3648_s17 + $0x58] sm:$0xff] %v2544_v41 }
 0x203   : > { %2217 = vst [vmem:[%s3648_s17 + $0x28] sm:$0xff] %v2538_v1 }
 0x204   : > { %3075 = shalt.err (!%p3072_p7)
}
 0x205   : > { %s3076_s24 = scalar_lea.hbm %s3675_s28, 1536  ;;  %s3080_s26 = scalar_lea.hbm %s3727_s2, 3072 }
 0x206   : > { %p3077_p9 = scmp.ne.s32.totalorder %s3675_s28, %s3076_s24  ;;  %p3081_p5 = scmp.lt.u32.totalorder %s3675_s28, %s3727_s2 }
 0x207   : > { %p3082_p11 = scmp.lt.u32.totalorder %s3080_s26, %s3076_s24  ;;  %p3084_p4 = scmp.lt.u32.totalorder %s3076_s24, %s3675_s28 }
 0x208   : > { %p3078_p2 = pnand %p3077_p9, %p3249_p12 }
 0x209   : > { %p3083_p1 = por %p3082_p11, %p3081_p5 }
 0x20a   : > { %p3079_p0 = pneg %p3078_p2 }
 0x20b   : > { %p3085_p6 = por %p3084_p4, %p3083_p1 }
 0x20d   : > { %p3086_p8 = pnand %p3085_p6, %p3079_p0 }
 0x20f   : > { %3089 = shalt.err (!%p3086_p8)
}
 0x210   : > { %s3141_s3 = smov 128   ;;  %s3142_s15 = smov 8  }
 0x211   : > { %2681 = dma.vmem_to_hbm [thread:$0]  (%p3249_p12), %s3677_s22, 1536, %s3675_s28, %s2225_s4, %s3141_s3, %s3141_s3, %s3142_s15  }
 0x212 PF: > { %s2253_s17 = sand.u32 1, %s3120_s9   ;;  %p3742_p10 = scmp.ne.s32.totalorder %s3732_s16, 0 }
 0x213   : > { %p3743_p13 = scmp.ge.s32.totalorder %s3132_s12, 2  ;;  %s2254_s27 = scalar_lea.sflag [#allocation4], %s2253_s17 }
 0x215   : > { %p2692_p3 = pnand %p3743_p13, %p3742_p10 }
 0x217   : > { %3115 = dma.done.wait (!%p2692_p3), %s2254_s27, 1536  }
 0x218   : > { %3117 = vsyncadd (!%p2692_p3), %s2254_s27, 4294965760  ;;  %p16_p7 = scmp.ge.s32.totalorder %s3214_s21, 4   ;;  %s3744_s9 = smov %s3124_s10 }
 0x219   : > { %s3745_s10 = smov %s3128_s11  ;;  %s3746_s11 = smov %s3245_s8 }
 0x21a   : > { %s3747_s12 = smov %s3214_s21  ;;  %18 = sbr.rel (!%p16_p7) target bundleno = 6 (0x6), region = 81 }
 0x221   :  { %2259 = vsyncpa [#allocation3], 1 }
 0x222   :  { %2261 = vsyncpa [#allocation3 + $0x1], 1 }
 0x223   :  { %2262 = vsyncpa [#allocation6], 1 }
 0x224   :  { %2263 = vsyncpa [#allocation4], 1 }
 0x225   :  { %2265 = vsyncpa [#allocation4 + $0x1], 1 }

</bundles_post_ra>
